<compile_context>
chip_gen: v7x
topology: tpu7x:2x2x1
jax: 0.10.0
libtpu: 0.0.40
codegen_flags: <defaults>
</compile_context>

<pallas_src>
import jax
import jax.numpy as jnp
from jax.experimental import pallas as pl
from jax.experimental.pallas import tpu as pltpu


def linear_attention(x, w_qkv, w_out, b_out, g, *, heads, dim_head):
    """x: (B, C, H, W); w_qkv: (3*hidden, C, 1, 1); w_out: (C, hidden, 1, 1);
    b_out: (C,); g: (1, C, 1, 1).  Returns (B, C, H, W) float32."""
    b, c, h, w = x.shape
    n = h * w
    hidden = heads * dim_head
    dim = w_out.shape[0]
    scale = float(dim_head) ** -0.5
    eps = 1e-5  # compute is done in float32 -> torch uses 1e-5 for float32
    ctx_scale = scale / float(n)  # fold q*scale and v/(h*w) into the small context tensor

    x2 = x.astype(jnp.float32).reshape(b, c, n)
    w_qkv2 = w_qkv.astype(jnp.float32).reshape(3 * hidden, c)
    w_out2 = w_out.astype(jnp.float32).reshape(dim, hidden)
    b_out2 = b_out.astype(jnp.float32).reshape(dim, 1)
    g2 = g.astype(jnp.float32).reshape(dim, 1)

    def kernel(x_ref, wqkv_ref, wout_ref, bout_ref, g_ref, o_ref):
        xb = x_ref[0]                                              # (C, N)

        # ---- 1x1 conv (qkv projection) on the MXU ----
        qkv = jnp.dot(wqkv_ref[...], xb,
                      preferred_element_type=jnp.float32)          # (3*hidden, N)
        q = qkv[0 * hidden:1 * hidden].reshape(heads, dim_head, n)
        k = qkv[1 * hidden:2 * hidden].reshape(heads, dim_head, n)
        v = qkv[2 * hidden:3 * hidden].reshape(heads, dim_head, n)

        # ---- softmaxes ----
        # q: over dim_head (sublane axis);  k: over spatial (lane axis).
        q = jnp.exp(q - jnp.max(q, axis=1, keepdims=True))
        q = q * (1.0 / jnp.sum(q, axis=1, keepdims=True))          # (H, D, N)
        k = jnp.exp(k - jnp.max(k, axis=2, keepdims=True))
        k = k * (1.0 / jnp.sum(k, axis=2, keepdims=True))          # (H, D, N)

        # ---- linear attention (per-head batched matmuls on the MXU) ----
        context = jnp.einsum('hdn,hen->hde', k, v,
                             preferred_element_type=jnp.float32)   # (H, D, D)
        context = context * ctx_scale                              # fold q*scale, v/n here
        out = jnp.einsum('hde,hdn->hen', context, q,
                         preferred_element_type=jnp.float32)       # (H, D, N)
        out = out.reshape(hidden, n)                               # 'b h c n -> b (h c) n'

        # ---- to_out: 1x1 conv (with bias) + channel LayerNorm * g ----
        y = jnp.dot(wout_ref[...], out,
                    preferred_element_type=jnp.float32) + bout_ref[...]   # (C, N)
        mean = jnp.mean(y, axis=0, keepdims=True)                  # (1, N)
        diff = y - mean
        var = jnp.mean(diff * diff, axis=0, keepdims=True)         # unbiased=False
        y = diff * jax.lax.rsqrt(var + eps) * g_ref[...]

        o_ref[0] = y.astype(o_ref.dtype)

    flops = int(b * (2 * (3 * hidden) * c * n                     # qkv projection
                     + 2 * 2 * heads * dim_head * dim_head * n    # two attention einsums
                     + 2 * dim * hidden * n))                      # output projection
    transcendentals = int(b * 2 * hidden * n)                      # exp in both softmaxes
    bytes_accessed = int(4 * (b * c * n + 3 * hidden * c + dim * hidden
                              + 2 * dim + b * dim * n))

    out = pl.pallas_call(
        kernel,
        out_shape=jax.ShapeDtypeStruct((b, dim, n), jnp.float32),
        grid_spec=pltpu.PrefetchScalarGridSpec(
            num_scalar_prefetch=0,
            grid=(b,),
            in_specs=[
                pl.BlockSpec((1, c, n), lambda i: (i, 0, 0)),
                pl.BlockSpec((3 * hidden, c), lambda i: (0, 0)),
                pl.BlockSpec((dim, hidden), lambda i: (0, 0)),
                pl.BlockSpec((dim, 1), lambda i: (0, 0)),
                pl.BlockSpec((dim, 1), lambda i: (0, 0)),
            ],
            out_specs=pl.BlockSpec((1, dim, n), lambda i: (i, 0, 0)),
        ),
        compiler_params=pltpu.CompilerParams(
            dimension_semantics=("parallel",)),
        cost_estimate=pl.CostEstimate(flops=flops,
                                      transcendentals=transcendentals,
                                      bytes_accessed=bytes_accessed),
    )(x2, w_qkv2, w_out2, b_out2, g2)

    return out.reshape(b, dim, h, w)


def _reference(x, w_qkv, w_out, b_out, g, *, heads, dim_head):
    b, c, h, w = x.shape
    n = h * w
    hidden = heads * dim_head
    scale = float(dim_head) ** -0.5
    xf = x.astype(jnp.float32).reshape(b, c, n)
    qkv = jnp.einsum('oc,bcn->bon', w_qkv.reshape(3 * hidden, c), xf)
    q, k, v = jnp.split(qkv, 3, axis=1)
    q = q.reshape(b, heads, dim_head, n)
    k = k.reshape(b, heads, dim_head, n)
    v = v.reshape(b, heads, dim_head, n)
    q = jax.nn.softmax(q, axis=-2) * scale
    k = jax.nn.softmax(k, axis=-1)
    v = v / n
    context = jnp.einsum('bhdn,bhen->bhde', k, v)
    out = jnp.einsum('bhde,bhdn->bhen', context, q).reshape(b, hidden, n)
    y = jnp.einsum('oc,bcn->bon', w_out.reshape(-1, hidden), out) + b_out.reshape(1, -1, 1)
    mean = jnp.mean(y, axis=1, keepdims=True)
    var = jnp.mean((y - mean) ** 2, axis=1, keepdims=True)
    y = (y - mean) * jax.lax.rsqrt(var + 1e-5) * g.reshape(1, -1, 1)
    return y.reshape(b, -1, h, w)


if __name__ == "__main__":
    # Small but lane/sublane-friendly shapes: C=8 channels, 16x16 spatial -> N=256
    # (multiple of 128 lanes), hidden = heads*dim_head = 128 (MXU-friendly).
    batch, dim, heads, dim_head = 2, 8, 4, 32
    h = w = 16
    hidden = heads * dim_head

    key = jax.random.PRNGKey(0)
    kx, kq, ko, kb = jax.random.split(key, 4)
    x = jax.random.normal(kx, (batch, dim, h, w), dtype=jnp.float32)
    # 1x1 conv weights, PyTorch layout (out_ch, in_ch, 1, 1).
    w_qkv = jax.random.normal(kq, (3 * hidden, dim, 1, 1), dtype=jnp.float32) * 0.1
    w_out = jax.random.normal(ko, (dim, hidden, 1, 1), dtype=jnp.float32) * 0.1
    b_out = jax.random.normal(kb, (dim,), dtype=jnp.float32) * 0.1
    g = jnp.ones((1, dim, 1, 1), dtype=jnp.float32)   # LayerNorm gain

    out = linear_attention(x, w_qkv, w_out, b_out, g, heads=heads, dim_head=dim_head)
    out = jax.block_until_ready(out)

    ref = _reference(x, w_qkv, w_out, b_out, g, heads=heads, dim_head=dim_head)
    assert out.shape == (batch, dim, h, w), out.shape
    assert jnp.allclose(out, ref, atol=1e-4, rtol=1e-4), "mismatch vs reference"

    print("KERNEL_OK")
</pallas_src>

<mosaic_0001>
module attributes {stable_mosaic.version = 11 : i64} {
  func.func @kernel(%arg0: i32, %arg1: memref<1x8x256xf32, #tpu.memory_space<vmem>>, %arg2: memref<384x8xf32, #tpu.memory_space<vmem>>, %arg3: memref<8x128xf32, #tpu.memory_space<vmem>>, %arg4: memref<8x1xf32, #tpu.memory_space<vmem>>, %arg5: memref<8x1xf32, #tpu.memory_space<vmem>>, %arg6: memref<1x8x256xf32, #tpu.memory_space<vmem>>) attributes {dimension_semantics = [#tpu.dimension_semantics<parallel>], iteration_bounds = array<i64: 2>, scalar_prefetch = 0 : i64, scratch_operands = 0 : i64, tpu.core_type = #tpu.core_type<tc>, window_params = [{transform_indices = @transform_0, window_bounds = array<i64: 1, 8, 256>}, {pipeline_mode = #tpu.pipeline_mode<synchronous>, transform_indices = @transform_1, window_bounds = array<i64: 384, 8>}, {pipeline_mode = #tpu.pipeline_mode<synchronous>, transform_indices = @transform_2, window_bounds = array<i64: 8, 128>}, {pipeline_mode = #tpu.pipeline_mode<synchronous>, transform_indices = @transform_3, window_bounds = array<i64: 8, 1>}, {pipeline_mode = #tpu.pipeline_mode<synchronous>, transform_indices = @transform_4, window_bounds = array<i64: 8, 1>}, {transform_indices = @transform_5, window_bounds = array<i64: 1, 8, 256>}]} {
    %c0 = arith.constant 0 : index
    %c0_0 = arith.constant 0 : index
    %c0_1 = arith.constant 0 : index
    %0 = vector.load %arg1[%c0, %c0_0, %c0_1] : memref<1x8x256xf32, #tpu.memory_space<vmem>>, vector<1x8x256xf32>
    %1 = vector.shape_cast %0 : vector<1x8x256xf32> to vector<8x256xf32>
    %c0_2 = arith.constant 0 : index
    %c0_3 = arith.constant 0 : index
    %2 = vector.load %arg2[%c0_2, %c0_3] : memref<384x8xf32, #tpu.memory_space<vmem>>, vector<384x8xf32>
    %cst = arith.constant dense<0.000000e+00> : vector<384x256xf32>
    %3 = tpu.matmul %2, %1, %cst {dimension_numbers = #tpu.dot_dimension_numbers<[1], [0], [0], [1], [0, 0, 1, 1], [], []>} : vector<384x8xf32>, vector<8x256xf32>, vector<384x256xf32> -> vector<384x256xf32>
    %4 = vector.extract_strided_slice %3 {offsets = [0, 0], sizes = [128, 256], strides = [1, 1]} : vector<384x256xf32> to vector<128x256xf32>
    %5 = vector.shape_cast %4 : vector<128x256xf32> to vector<4x32x256xf32>
    %6 = vector.extract_strided_slice %3 {offsets = [128, 0], sizes = [128, 256], strides = [1, 1]} : vector<384x256xf32> to vector<128x256xf32>
    %7 = vector.shape_cast %6 : vector<128x256xf32> to vector<4x32x256xf32>
    %8 = vector.extract_strided_slice %3 {offsets = [256, 0], sizes = [128, 256], strides = [1, 1]} : vector<384x256xf32> to vector<128x256xf32>
    %9 = vector.shape_cast %8 : vector<128x256xf32> to vector<4x32x256xf32>
    %cst_4 = arith.constant dense<0xFF800000> : vector<4x256xf32>
    %10 = vector.multi_reduction <maximumf>, %5, %cst_4 [1] : vector<4x32x256xf32> to vector<4x256xf32>
    %11 = vector.shape_cast %10 : vector<4x256xf32> to vector<4x1x256xf32>
    %12 = vector.broadcast %11 : vector<4x1x256xf32> to vector<4x32x256xf32>
    %13 = arith.subf %5, %12 : vector<4x32x256xf32>
    %14 = math.exp %13 : vector<4x32x256xf32>
    %cst_5 = arith.constant dense<0.000000e+00> : vector<4x256xf32>
    %15 = vector.multi_reduction <add>, %14, %cst_5 [1] : vector<4x32x256xf32> to vector<4x256xf32>
    %16 = vector.shape_cast %15 : vector<4x256xf32> to vector<4x1x256xf32>
    %cst_6 = arith.constant 1.000000e+00 : f32
    %17 = vector.broadcast %cst_6 : f32 to vector<4x1x256xf32>
    %18 = arith.divf %17, %16 : vector<4x1x256xf32>
    %19 = vector.broadcast %18 : vector<4x1x256xf32> to vector<4x32x256xf32>
    %20 = arith.mulf %14, %19 : vector<4x32x256xf32>
    %cst_7 = arith.constant dense<0xFF800000> : vector<4x32xf32>
    %21 = vector.multi_reduction <maximumf>, %7, %cst_7 [2] : vector<4x32x256xf32> to vector<4x32xf32>
    %22 = vector.shape_cast %21 : vector<4x32xf32> to vector<4x32x1xf32>
    %23 = vector.broadcast %22 : vector<4x32x1xf32> to vector<4x32x256xf32>
    %24 = arith.subf %7, %23 : vector<4x32x256xf32>
    %25 = math.exp %24 : vector<4x32x256xf32>
    %cst_8 = arith.constant dense<0.000000e+00> : vector<4x32xf32>
    %26 = vector.multi_reduction <add>, %25, %cst_8 [2] : vector<4x32x256xf32> to vector<4x32xf32>
    %27 = vector.shape_cast %26 : vector<4x32xf32> to vector<4x32x1xf32>
    %cst_9 = arith.constant 1.000000e+00 : f32
    %28 = vector.broadcast %cst_9 : f32 to vector<4x32x1xf32>
    %29 = arith.divf %28, %27 : vector<4x32x1xf32>
    %30 = vector.broadcast %29 : vector<4x32x1xf32> to vector<4x32x256xf32>
    %31 = arith.mulf %25, %30 : vector<4x32x256xf32>
    "tpu.trace_start"() <{level = 10 : i32, message = "hdn,hen->hde"}> : () -> ()
    %cst_10 = arith.constant dense<0.000000e+00> : vector<4x32x32xf32>
    %32 = tpu.matmul %31, %9, %cst_10 {dimension_numbers = #tpu.dot_dimension_numbers<[2], [2], [1], [1], [0, 0, 0, 1, 1, 1], [0], [0]>} : vector<4x32x256xf32>, vector<4x32x256xf32>, vector<4x32x32xf32> -> vector<4x32x32xf32>
    "tpu.trace_stop"() : () -> ()
    %cst_11 = arith.constant 6.90533954E-4 : f32
    %33 = vector.broadcast %cst_11 : f32 to vector<4x32x32xf32>
    %34 = arith.mulf %32, %33 : vector<4x32x32xf32>
    "tpu.trace_start"() <{level = 10 : i32, message = "hde,hdn->hen"}> : () -> ()
    %cst_12 = arith.constant dense<0.000000e+00> : vector<4x32x256xf32>
    %35 = tpu.matmul %34, %20, %cst_12 {dimension_numbers = #tpu.dot_dimension_numbers<[1], [1], [2], [2], [0, 0, 0, 2, 1, 2], [0], [0]>} : vector<4x32x32xf32>, vector<4x32x256xf32>, vector<4x32x256xf32> -> vector<4x32x256xf32>
    "tpu.trace_stop"() : () -> ()
    %36 = vector.shape_cast %35 : vector<4x32x256xf32> to vector<128x256xf32>
    %c0_13 = arith.constant 0 : index
    %c0_14 = arith.constant 0 : index
    %37 = vector.load %arg3[%c0_13, %c0_14] : memref<8x128xf32, #tpu.memory_space<vmem>>, vector<8x128xf32>
    %cst_15 = arith.constant dense<0.000000e+00> : vector<8x256xf32>
    %38 = tpu.matmul %37, %36, %cst_15 {dimension_numbers = #tpu.dot_dimension_numbers<[1], [0], [0], [1], [0, 0, 1, 1], [], []>} : vector<8x128xf32>, vector<128x256xf32>, vector<8x256xf32> -> vector<8x256xf32>
    %c0_16 = arith.constant 0 : index
    %c0_17 = arith.constant 0 : index
    %39 = vector.load %arg4[%c0_16, %c0_17] : memref<8x1xf32, #tpu.memory_space<vmem>>, vector<8x1xf32>
    %40 = vector.broadcast %39 : vector<8x1xf32> to vector<8x256xf32>
    %41 = arith.addf %38, %40 : vector<8x256xf32>
    %cst_18 = arith.constant dense<0.000000e+00> : vector<256xf32>
    %42 = vector.multi_reduction <add>, %41, %cst_18 [0] : vector<8x256xf32> to vector<256xf32>
    %43 = vector.shape_cast %42 : vector<256xf32> to vector<1x256xf32>
    %cst_19 = arith.constant 8.000000e+00 : f32
    %44 = vector.broadcast %cst_19 : f32 to vector<1x256xf32>
    %45 = arith.divf %43, %44 : vector<1x256xf32>
    %46 = vector.broadcast %45 : vector<1x256xf32> to vector<8x256xf32>
    %47 = arith.subf %41, %46 : vector<8x256xf32>
    %48 = arith.mulf %47, %47 : vector<8x256xf32>
    %cst_20 = arith.constant dense<0.000000e+00> : vector<256xf32>
    %49 = vector.multi_reduction <add>, %48, %cst_20 [0] : vector<8x256xf32> to vector<256xf32>
    %50 = vector.shape_cast %49 : vector<256xf32> to vector<1x256xf32>
    %cst_21 = arith.constant 8.000000e+00 : f32
    %51 = vector.broadcast %cst_21 : f32 to vector<1x256xf32>
    %52 = arith.divf %50, %51 : vector<1x256xf32>
    %cst_22 = arith.constant 9.99999974E-6 : f32
    %53 = vector.broadcast %cst_22 : f32 to vector<1x256xf32>
    %54 = arith.addf %52, %53 : vector<1x256xf32>
    %55 = math.rsqrt %54 : vector<1x256xf32>
    %56 = vector.broadcast %55 : vector<1x256xf32> to vector<8x256xf32>
    %57 = arith.mulf %47, %56 : vector<8x256xf32>
    %c0_23 = arith.constant 0 : index
    %c0_24 = arith.constant 0 : index
    %58 = vector.load %arg5[%c0_23, %c0_24] : memref<8x1xf32, #tpu.memory_space<vmem>>, vector<8x1xf32>
    %59 = vector.broadcast %58 : vector<8x1xf32> to vector<8x256xf32>
    %60 = arith.mulf %57, %59 : vector<8x256xf32>
    %c0_25 = arith.constant 0 : index
    %c0_26 = arith.constant 0 : index
    %c0_27 = arith.constant 0 : index
    %61 = vector.load %arg6[%c0_25, %c0_26, %c0_27] : memref<1x8x256xf32, #tpu.memory_space<vmem>>, vector<1x8x256xf32>
    %62 = vector.shape_cast %61 : vector<1x8x256xf32> to vector<8x256xf32>
    %63 = vector.shape_cast %60 : vector<8x256xf32> to vector<1x8x256xf32>
    tpu.vector_store %arg6[%c0_25, %c0_26, %c0_27], %63 {strides = array<i32>} : memref<1x8x256xf32, #tpu.memory_space<vmem>>, vector<1x8x256xf32>,
    return
  }
  func.func @transform_0(%arg0: i32) -> (i32, i32, i32) {
    %c0_i32 = arith.constant 0 : i32
    %c0_i32_0 = arith.constant 0 : i32
    %c0_i32_1 = arith.constant 0 : i32
    return %arg0, %c0_i32, %c0_i32_0 : i32, i32, i32
  }
  func.func @transform_1(%arg0: i32) -> (i32, i32) {
    %c0_i32 = arith.constant 0 : i32
    %c0_i32_0 = arith.constant 0 : i32
    %c0_i32_1 = arith.constant 0 : i32
    return %c0_i32, %c0_i32_0 : i32, i32
  }
  func.func @transform_2(%arg0: i32) -> (i32, i32) {
    %c0_i32 = arith.constant 0 : i32
    %c0_i32_0 = arith.constant 0 : i32
    %c0_i32_1 = arith.constant 0 : i32
    return %c0_i32, %c0_i32_0 : i32, i32
  }
  func.func @transform_3(%arg0: i32) -> (i32, i32) {
    %c0_i32 = arith.constant 0 : i32
    %c0_i32_0 = arith.constant 0 : i32
    %c0_i32_1 = arith.constant 0 : i32
    return %c0_i32, %c0_i32_0 : i32, i32
  }
  func.func @transform_4(%arg0: i32) -> (i32, i32) {
    %c0_i32 = arith.constant 0 : i32
    %c0_i32_0 = arith.constant 0 : i32
    %c0_i32_1 = arith.constant 0 : i32
    return %c0_i32, %c0_i32_0 : i32, i32
  }
  func.func @transform_5(%arg0: i32) -> (i32, i32, i32) {
    %c0_i32 = arith.constant 0 : i32
    %c0_i32_0 = arith.constant 0 : i32
    %c0_i32_1 = arith.constant 0 : i32
    return %arg0, %c0_i32, %c0_i32_0 : i32, i32, i32
  }
}

</mosaic_0001>

<bundles_post_ra>
// kernel: tpu_custom_call.1
= control target key start
LH: loop header
LB: loop body
LE: loop exit
PB: predicated region body
PF: predicated region fallthrough
CT: control target
= control target key end

     0   :  { %10 = vsyncpa [#allocation3], 0  ;;  %s4034_s0 = inlined_call_operand.vmem [shape: f32[2,8,256], index: 0, kind: input, shape index: {}]   ;;  %s4035_s1 = inlined_call_operand.vmem [shape: f32[384,8], index: 1, kind: input, shape index: {}]   ;;  %s4036_s2 = inlined_call_operand.vmem [shape: f32[8,128], index: 2, kind: input, shape index: {}]   ;;  %s4037_s3 = inlined_call_operand.vmem [shape: f32[8,1], index: 3, kind: input, shape index: {}]   ;;  %s4038_s4 = inlined_call_operand.vmem [shape: f32[8,1], index: 4, kind: input, shape index: {}]   ;;  %s4039_s5 = inlined_call_operand.hbm [shape: f32[2,8,256], index: 5, kind: output, shape index: {}]  }
   0x1   :  { %12 = vsyncpa [#allocation3 + $0x1], 0  ;;  %s2901_s18 = smov 0   ;;  %s2903_s19 = smov 0  }
   0x2   :  { %s2905_s20 = smov 0   ;;  %s2907_s21 = smov 0  }
   0x3 LB: > { %s2922_s22 = sadd.s32 4294967295, %s2866_s21   ;;  %s2405_s23 = sadd.s32 4294967294, %s2866_s21   ;;  %s2866_s21 = sphi %s2907_s21, %s4171_s21   ;;  %s2862_s20 = sphi %s2905_s20, %s4170_s20   ;;  %s2858_s19 = sphi %s2903_s19, %s4169_s19   ;;  %s2854_s18 = sphi %s2901_s18, %s4168_s18  }
   0x4   : > { %s2926_s24 = sadd.s32 1, %s2866_s21   ;;  %s135_s25 = sadd.s32 1, %s2862_s20 }
   0x5   : > { %s132_s26 = ssub.s32 %s2866_s21, %s2926_s24  ;;  %p145_p0 = scmp.ne.s32.totalorder %s2862_s20, %s2858_s19 }
   0x6   : > { %p133_p1 = scmp.eq.s32.totalorder %s132_s26, 0  ;;  %p146_p2 = scmp.eq.s32.totalorder %s2922_s22, 1 }
   0x7   : > { %p151_p3 = scmp.ne.s32.totalorder %s2858_s19, %s2854_s18  ;;  %p152_p4 = scmp.eq.s32.totalorder %s2405_s23, 1 }
   0x8   : > { %s2937_s27 = scalar_select %p133_p1, %s2862_s20, %s135_s25  }
   0x9   : > { %p2939_p5 = por %p146_p2, %p145_p0  ;;  %p2943_p6 = por %p152_p4, %p151_p3 }
   0xa   : > { %p2408_p7 = scmp.ge.s32.totalorder %s2866_s21, 1  ;;  %p190_p8 = scmp.lt.s32.totalorder %s2866_s21, 3 }
   0xc   : > { %p191_p9 = pnand %p2408_p7, %p190_p8 }
   0xe   : > { %194 = sbr.rel (%p191_p9) target bundleno = 1530 (0x5fa), region = 40 }
  0x15   : > { %p218_p10 = scmp.lt.s32.totalorder %s2922_s22, 1  ;;  %v4040_v0 = vmov 0.0   ;;  %v225_v3 = vld [vmem:[%s4035_s1] sm:$0xff]  ;;  %vm273_vm0 = vcmask 64512   ;;  %v226_v4 = vld [vmem:[%s4035_s1 + $0x8] sm:$0xff]  ;;  %v227_v5 = vld [vmem:[%s4035_s1 + $0x10] sm:$0xff] }
  0x16   : > { %482 = vmatprep.mubr.f32.mxu0 %v4040_v0  ;;  %740 = vmatprep.mubr.f32.mxu1 %v4040_v0  ;;  %v228_v6 = vld [vmem:[%s4035_s1 + $0x18] sm:$0xff]  ;;  %v229_v7 = vld [vmem:[%s4035_s1 + $0x20] sm:$0xff]  ;;  %v230_v8 = vld [vmem:[%s4035_s1 + $0x28] sm:$0xff]  ;;  %vm1703_vm1 = vcmask 261120   ;;  %s215_s16 = sand.u32 1, %s2858_s19   ;;  %s2482_s23 = sshll.u32 %s2922_s22, 8 }
  0x17   : > { %s219_s30 = scalar_select %p218_p10, %s2922_s22, 1  ;;  %v231_v9 = vld [vmem:[%s4035_s1 + $0x30] sm:$0xff]  ;;  %v232_v10 = vld [vmem:[%s4035_s1 + $0x38] sm:$0xff]  ;;  %v233_v11 = vld [vmem:[%s4035_s1 + $0x40] sm:$0xff] }
  0x18   : > { %v234_v12 = vld [vmem:[%s4035_s1 + $0x48] sm:$0xff]  ;;  %v235_v13 = vld [vmem:[%s4035_s1 + $0x50] sm:$0xff]  ;;  %v236_v14 = vld [vmem:[%s4035_s1 + $0x58] sm:$0xff]  ;;  %s2409_s17 = sshll.u32 %s215_s16, 4  ;;  %s3992_s7 = scalar_lea.hbm %s4039_s5, %s2482_s23 }
  0x19   : > { %s2481_s6 = sshll.u32 %s219_s30, 4  ;;  %v237_v15 = vld [vmem:[%s4035_s1 + $0x60] sm:$0xff]  ;;  %v238_v16 = vld [vmem:[%s4035_s1 + $0x68] sm:$0xff]  ;;  %v239_v17 = vld [vmem:[%s4035_s1 + $0x70] sm:$0xff]  ;;  %s217_s25 = scalar_lea.vmem [#allocation2], %s2409_s17 }
  0x1a   : > { %s222_s9 = scalar_lea.vmem %s4034_s0, %s2481_s6  ;;  %v240_v18 = vld [vmem:[%s4035_s1 + $0x78] sm:$0xff]  ;;  %v241_v19 = vld [vmem:[%s4035_s1 + $0x80] sm:$0xff]  ;;  %v242_v20 = vld [vmem:[%s4035_s1 + $0x88] sm:$0xff]  ;;  %s2346_s26 = sshll.u32 %s217_s25, 4  ;;  %s3994_s26 = int_to_ptr.vmem [resolvable:$true] %s2346_s26 }
  0x1b   : > { %v224_v1 = vld [vmem:[%s222_s9 + $0x8] sm:$0xff]  ;;  %v223_v2 = vld [vmem:[%s222_s9] sm:$0xff]  ;;  %v243_v21 = vld [vmem:[%s4035_s1 + $0x90] sm:$0xff]  ;;  %s2332_s8 = scalar_lea.sflag [#allocation3], %s215_s16  ;;  %s2804_s9 = scalar_lea.vmem %s3994_s26, 256 }
  0x1c   : > { %418 = vmatprep.subr.mxu0 %v224_v1  ;;  %2579 = vmatprep.subr.mxu1 %v224_v1  ;;  %v244_v22 = vld [vmem:[%s4035_s1 + $0x98] sm:$0xff]  ;;  %v245_v23 = vld [vmem:[%s4035_s1 + $0xa0] sm:$0xff]  ;;  %v246_v24 = vld [vmem:[%s4035_s1 + $0xa8] sm:$0xff]  ;;  %p2805_p11 = scmp.ne.s32.totalorder %s3994_s26, %s2804_s9  ;;  %s2870_s22 = smov [#allocation2]  }
  0x1d   : > { %419 = vmatpush1.msra.mxu0 %v223_v2  ;;  %2580 = vmatpush1.msra.mxu1 %v223_v2  ;;  %v247_v25 = vld [vmem:[%s4035_s1 + $0xb0] sm:$0xff]  ;;  %v248_v26 = vld [vmem:[%s4035_s1 + $0xb8] sm:$0xff]  ;;  %v249_v27 = vld [vmem:[%s4035_s1 + $0xc0] sm:$0xff]  ;;  %s2808_s10 = sshll.u32 %s2870_s22, 4  ;;  %s2809_s10 = int_to_ptr.vmem [resolvable:$false] %s2808_s10 }
  0x1e   : > { %2412 = vmatmul.mubr.msk.f32.vlgmr.msra.gmra.mrb[0].mxu0 %vm273_vm0, %v225_v3  ;;  %v250_v28 = vld [vmem:[%s4035_s1 + $0xc8] sm:$0xff]  ;;  %v251_v29 = vld [vmem:[%s4035_s1 + $0xd0] sm:$0xff]  ;;  %v252_v30 = vld [vmem:[%s4035_s1 + $0xd8] sm:$0xff]  ;;  %p2806_p12 = pnand %p2805_p11, %p2939_p5  ;;  %s2810_s11 = scalar_lea.vmem %s2809_s10, 512 }
  0x1f   : > { %488 = vmatprep.mubr.f32.mxu0 %v4040_v0  ;;  %v253_v31 = vld [vmem:[%s4035_s1 + $0xe0] sm:$0xff]  ;;  %v254_v32 = vld [vmem:[%s4035_s1 + $0xe8] sm:$0xff]  ;;  %v255_v33 = vld [vmem:[%s4035_s1 + $0xf0] sm:$0xff]  ;;  %p2811_p0 = scmp.lt.s32.totalorder %s3994_s26, %s2809_s10  ;;  %p2812_p1 = scmp.lt.s32.totalorder %s2810_s11, %s2804_s9 }
  0x20   : > { %v256_v34 = vld [vmem:[%s4035_s1 + $0xf8] sm:$0xff]  ;;  %v257_v36 = vld [vmem:[%s4035_s1 + $0x100] sm:$0xff]  ;;  %v258_v38 = vld [vmem:[%s4035_s1 + $0x108] sm:$0xff]  ;;  %p2807_p13 = pneg %p2806_p12 }
  0x21   : > { %v268_v39 = vld [vmem:[%s4035_s1 + $0x158] sm:$0xff]  ;;  %v269_v43 = vld [vmem:[%s4035_s1 + $0x160] sm:$0xff]  ;;  %v259_v45 = vld [vmem:[%s4035_s1 + $0x110] sm:$0xff]  ;;  %p2813_p2 = por %p2812_p1, %p2811_p0 }
  0x22   : > { %2413 = vmatmul.mubr.msk.f32.gmra.mrb[2].mxu0 %vm273_vm0, %v226_v4  ;;  %2455 = vmatmul.mubr.msk.f32.vlgmr.msra.gmra.mrb[0].mxu1 %vm273_vm0, %v268_v39  ;;  %v270_v49 = vld [vmem:[%s4035_s1 + $0x168] sm:$0xff]  ;;  %v260_v51 = vld [vmem:[%s4035_s1 + $0x118] sm:$0xff]  ;;  %v271_v55 = vld [vmem:[%s4035_s1 + $0x170] sm:$0xff] }
  0x23   : > { %494 = vmatprep.mubr.f32.mxu0 %v4040_v0  ;;  %746 = vmatprep.mubr.f32.mxu1 %v4040_v0  ;;  %v261_v57 = vld [vmem:[%s4035_s1 + $0x120] sm:$0xff]  ;;  %v272_v63 = vld [vmem:[%s4035_s1 + $0x178] sm:$0xff]  ;;  %v262_v2 = vld [vmem:[%s4035_s1 + $0x128] sm:$0xff]  ;;  %p2814_p3 = pnand %p2813_p2, %p2807_p13 }
  0x26   : > { %2414 = vmatmul.mubr.msk.f32.gmra.mrb[4].mxu0 %vm273_vm0, %v227_v5  ;;  %2456 = vmatmul.mubr.msk.f32.gmra.mrb[2].mxu1 %vm273_vm0, %v269_v43 }
  0x27   : > { %500 = vmatprep.mubr.f32.mxu0 %v4040_v0  ;;  %752 = vmatprep.mubr.f32.mxu1 %v4040_v0 }
  0x2a   : > { %2415 = vmatmul.mubr.msk.f32.gmra.mrb[6].mxu0 %vm273_vm0, %v228_v6  ;;  %2457 = vmatmul.mubr.msk.f32.gmra.mrb[4].mxu1 %vm273_vm0, %v270_v49 }
  0x2b   : > { %506 = vmatprep.mubr.f32.mxu0 %v4040_v0  ;;  %758 = vmatprep.mubr.f32.mxu1 %v4040_v0 }
  0x2e   : > { %2416 = vmatmul.mubr.msk.f32.gmra.mrb[8].mxu0 %vm273_vm0, %v229_v7  ;;  %2458 = vmatmul.mubr.msk.f32.gmra.mrb[6].mxu1 %vm273_vm0, %v271_v55 }
  0x2f   : > { %512 = vmatprep.mubr.f32.mxu0 %v4040_v0  ;;  %764 = vmatprep.mubr.f32.mxu1 %v4040_v0 }
  0x32   : > { %2417 = vmatmul.mubr.msk.f32.gmra.mrb[10].mxu0 %vm273_vm0, %v230_v8  ;;  %2459 = vmatmul.mubr.msk.f32.gmra.mrb[8].mxu1 %vm273_vm0, %v272_v63 }
  0x33   : > { %518 = vmatprep.mubr.f32.mxu0 %v4040_v0 }
  0x36   : > { %2418 = vmatmul.mubr.msk.f32.gmra.mrb[12].mxu0 %vm273_vm0, %v231_v9 }
  0x37   : > { %524 = vmatprep.mubr.f32.mxu0 %v4040_v0 }
  0x3a   : > { %2419 = vmatmul.mubr.msk.f32.gmra.mrb[14].mxu0 %vm273_vm0, %v232_v10 }
  0x3b   : > { %530 = vmatprep.mubr.f32.mxu0 %v4040_v0 }
  0x3e   : > { %2420 = vmatmul.mubr.msk.f32.gmra.mrb[16].mxu0 %vm273_vm0, %v233_v11  ;;  %v263_v11 = vld [vmem:[%s4035_s1 + $0x130] sm:$0xff] }
  0x3f   : > { %536 = vmatprep.mubr.f32.mxu0 %v4040_v0 }
  0x42   : > { %2421 = vmatmul.mubr.msk.f32.gmra.mrb[18].mxu0 %vm273_vm0, %v234_v12 }
  0x43   : > { %542 = vmatprep.mubr.f32.mxu0 %v4040_v0 }
  0x46   : > { %2422 = vmatmul.mubr.msk.f32.gmra.mrb[20].mxu0 %vm273_vm0, %v235_v13 }
  0x47   : > { %548 = vmatprep.mubr.f32.mxu0 %v4040_v0 }
  0x4a   : > { %2423 = vmatmul.mubr.msk.f32.gmra.mrb[22].mxu0 %vm273_vm0, %v236_v14 }
  0x4b   : > { %554 = vmatprep.mubr.f32.mxu0 %v4040_v0 }
  0x4e   : > { %2424 = vmatmul.mubr.msk.f32.gmra.mrb[24].mxu0 %vm273_vm0, %v237_v15 }
  0x4f   : > { %560 = vmatprep.mubr.f32.mxu0 %v4040_v0 }
  0x52   : > { %2425 = vmatmul.mubr.msk.f32.gmra.mrb[26].mxu0 %vm273_vm0, %v238_v16 }
  0x53   : > { %566 = vmatprep.mubr.f32.mxu0 %v4040_v0 }
  0x56   : > { %2426 = vmatmul.mubr.msk.f32.gmra.mrb[28].mxu0 %vm273_vm0, %v239_v17 }
  0x57   : > { %572 = vmatprep.mubr.f32.mxu0 %v4040_v0 }
  0x5a   : > { %2427 = vmatmul.mubr.msk.f32.gmra.mrb[30].mxu0 %vm273_vm0, %v240_v18 }
  0x5b   : > { %578 = vmatprep.mubr.f32.mxu0 %v4040_v0 }
  0x5e   : > { %2428 = vmatmul.mubr.msk.f32.gmra.mrb[32].mxu0 %vm273_vm0, %v241_v19 }
  0x5f   : > { %584 = vmatprep.mubr.f32.mxu0 %v4040_v0 }
  0x62   : > { %2429 = vmatmul.mubr.msk.f32.gmra.mrb[34].mxu0 %vm273_vm0, %v242_v20  ;;  %v264_v20 = vld [vmem:[%s4035_s1 + $0x138] sm:$0xff] }
  0x63   : > { %590 = vmatprep.mubr.f32.mxu0 %v4040_v0 }
  0x66   : > { %2430 = vmatmul.mubr.msk.f32.gmra.mrb[36].mxu0 %vm273_vm0, %v243_v21 }
  0x67   : > { %596 = vmatprep.mubr.f32.mxu0 %v4040_v0 }
  0x6a   : > { %2431 = vmatmul.mubr.msk.f32.gmra.mrb[38].mxu0 %vm273_vm0, %v244_v22 }
  0x6b   : > { %602 = vmatprep.mubr.f32.mxu0 %v4040_v0 }
  0x6e   : > { %2432 = vmatmul.mubr.msk.f32.gmra.mrb[40].mxu0 %vm273_vm0, %v245_v23 }
  0x6f   : > { %608 = vmatprep.mubr.f32.mxu0 %v4040_v0 }
  0x72   : > { %2433 = vmatmul.mubr.msk.f32.gmra.mrb[42].mxu0 %vm273_vm0, %v246_v24 }
  0x73   : > { %614 = vmatprep.mubr.f32.mxu0 %v4040_v0 }
  0x76   : > { %2434 = vmatmul.mubr.msk.f32.gmra.mrb[44].mxu0 %vm273_vm0, %v247_v25 }
  0x77   : > { %620 = vmatprep.mubr.f32.mxu0 %v4040_v0 }
  0x7a   : > { %2435 = vmatmul.mubr.msk.f32.gmra.mrb[46].mxu0 %vm273_vm0, %v248_v26 }
  0x7b   : > { %626 = vmatprep.mubr.f32.mxu0 %v4040_v0 }
  0x7e   : > { %2436 = vmatmul.mubr.msk.f32.gmra.mrb[48].mxu0 %vm273_vm0, %v249_v27 }
  0x7f   : > { %632 = vmatprep.mubr.f32.mxu0 %v4040_v0 }
  0x82   : > { %2437 = vmatmul.mubr.msk.f32.gmra.mrb[50].mxu0 %vm273_vm0, %v250_v28 }
  0x83   : > { %638 = vmatprep.mubr.f32.mxu0 %v4040_v0 }
  0x86   : > { %2438 = vmatmul.mubr.msk.f32.gmra.mrb[52].mxu0 %vm273_vm0, %v251_v29 }
  0x87   : > { %644 = vmatprep.mubr.f32.mxu0 %v4040_v0 }
  0x8a   : > { %2439 = vmatmul.mubr.msk.f32.gmra.mrb[54].mxu0 %vm273_vm0, %v252_v30 }
  0x8b   : > { %650 = vmatprep.mubr.f32.mxu0 %v4040_v0 }
  0x8e   : > { %2440 = vmatmul.mubr.msk.f32.gmra.mrb[56].mxu0 %vm273_vm0, %v253_v31 }
  0x8f   : > { %656 = vmatprep.mubr.f32.mxu0 %v4040_v0 }
  0x92   : > { %2441 = vmatmul.mubr.msk.f32.gmra.mrb[58].mxu0 %vm273_vm0, %v254_v32 }
  0x93   : > { %662 = vmatprep.mubr.f32.mxu0 %v4040_v0 }
  0x96   : > { %2442 = vmatmul.mubr.msk.f32.gmra.mrb[60].mxu0 %vm273_vm0, %v255_v33 }
  0x97   : > { %668 = vmatprep.mubr.f32.mxu0 %v4040_v0 }
  0x9a   : > { %2443 = vmatmul.mubr.msk.f32.gmra.mrb[62].mxu0 %vm273_vm0, %v256_v34 }
  0x9b   : > { %674 = vmatprep.mubr.f32.mxu0 %v4040_v0 }
  0x9e   : > { %2444 = vmatmul.mubr.msk.f32.gmra.mrb[64].mxu0 %vm273_vm0, %v257_v36 }
  0x9f   : > { %680 = vmatprep.mubr.f32.mxu0 %v4040_v0 }
  0xa2   : > { %2445 = vmatmul.mubr.msk.f32.gmra.mrb[66].mxu0 %vm273_vm0, %v258_v38 }
  0xa3   : > { %686 = vmatprep.mubr.f32.mxu0 %v4040_v0 }
  0xa6   : > { %2446 = vmatmul.mubr.msk.f32.gmra.mrb[68].mxu0 %vm273_vm0, %v259_v45 }
  0xa7   : > { %692 = vmatprep.mubr.f32.mxu0 %v4040_v0 }
  0xaa   : > { %2447 = vmatmul.mubr.msk.f32.gmra.mrb[70].mxu0 %vm273_vm0, %v260_v51 }
  0xab   : > { %698 = vmatprep.mubr.f32.mxu0 %v4040_v0 }
  0xae   : > { %2448 = vmatmul.mubr.msk.f32.gmra.mrb[72].mxu0 %vm273_vm0, %v261_v57 }
  0xaf   : > { %704 = vmatprep.mubr.f32.mxu0 %v4040_v0 }
  0xb2   : > { %2449 = vmatmul.mubr.msk.f32.gmra.mrb[74].mxu0 %vm273_vm0, %v262_v2 }
  0xb3   : > { %710 = vmatprep.mubr.f32.mxu0 %v4040_v0 }
  0xb6   : > { %2450 = vmatmul.mubr.msk.f32.gmra.mrb[76].mxu0 %vm273_vm0, %v263_v11 }
  0xb7   : > { %716 = vmatprep.mubr.f32.mxu0 %v4040_v0 }
  0xba   : > { %2451 = vmatmul.mubr.msk.f32.gmra.mrb[78].mxu0 %vm273_vm0, %v264_v20 }
  0xbb   : > { %722 = vmatprep.mubr.f32.mxu0 %v4040_v0 }
  0xf1   : > { %v3116_v35 = vpop.f32.mrb[0].mxu0 }
  0xf2   : > { %v3121_v37 = vpop.f32.mrb[1].mxu0 }
  0xf5   : > { %v3131_v40 = vpop.f32.mrb[2].mxu0 }
  0xf6   : > { %v771_v41 = vmax.f32 %v3116_v35, %v3131_v40  ;;  %v3136_v42 = vpop.f32.mrb[3].mxu0 }
  0xf7   : > { %v780_v44 = vmax.f32 %v3121_v37, %v3136_v42 }
  0xf9   : > { %v3149_v46 = vpop.f32.mrb[4].mxu0 }
  0xfa   : > { %v772_v47 = vmax.f32 %v771_v41, %v3149_v46  ;;  %v3153_v48 = vpop.f32.mrb[5].mxu0 }
  0xfb   : > { %v781_v50 = vmax.f32 %v780_v44, %v3153_v48 }
  0xfd   : > { %v502_v52 = vpop.f32.mrb[6].mxu0 }
  0xfe   : > { %v773_v53 = vmax.f32 %v772_v47, %v502_v52  ;;  %v3166_v54 = vpop.f32.mrb[7].mxu0 }
  0xff   : > { %v782_v56 = vmax.f32 %v781_v50, %v3166_v54 }
 0x100   : > { %v774_v58 = vrot.slane %v773_v53, 4 }
 0x101   : > { %v783_v59 = vrot.slane %v782_v56, 4  ;;  %v3178_v60 = vpop.f32.mrb[8].mxu0 }
 0x102   : > { %v775_v61 = vmax.f32 %v773_v53, %v774_v58  ;;  %v3181_v62 = vpop.f32.mrb[9].mxu0 }
 0x103   : > { %v784_v1 = vmax.f32 %v782_v56, %v783_v59  ;;  %v267_v56 = vld [vmem:[%s4035_s1 + $0x150] sm:$0xff] }
 0x104   : > { %v776_v3 = vrot.slane %v775_v61, 2 }
 0x105   : > { %v785_v4 = vrot.slane %v784_v1, 2  ;;  %v3192_v5 = vpop.f32.mrb[10].mxu0 }
 0x106   : > { %v777_v6 = vmax.f32 %v775_v61, %v776_v3  ;;  %v789_v7 = vmax.f32 %v3178_v60, %v3192_v5  ;;  %v3197_v8 = vpop.f32.mrb[11].mxu0 }
 0x107   : > { %v786_v9 = vmax.f32 %v784_v1, %v785_v4  ;;  %v798_v10 = vmax.f32 %v3181_v62, %v3197_v8 }
 0x108   : > { %v778_v12 = vrot.slane %v777_v6, 1 }
 0x109   : > { %v787_v13 = vrot.slane %v786_v9, 1  ;;  %v3206_v14 = vpop.f32.mrb[12].mxu0 }
 0x10a   : > { %v779_v15 = vmax.f32 %v777_v6, %v778_v12  ;;  %v790_v16 = vmax.f32 %v789_v7, %v3206_v14  ;;  %v3209_v17 = vpop.f32.mrb[13].mxu0 }
 0x10b   : > { %v788_v18 = vmax.f32 %v786_v9, %v787_v13  ;;  %v799_v19 = vmax.f32 %v798_v10, %v3209_v17 }
 0x10c   : > { %v843_v21 = vsub.f32 %v3116_v35, %v779_v15  ;;  %v845_v22 = vsub.f32 %v3131_v40, %v779_v15  ;;  %v847_v23 = vsub.f32 %v3149_v46, %v779_v15  ;;  %v849_v24 = vsub.f32 %v502_v52, %v779_v15  ;;  %v265_v35 = vld [vmem:[%s4035_s1 + $0x140] sm:$0xff]  ;;  %v266_v46 = vld [vmem:[%s4035_s1 + $0x148] sm:$0xff] }
 0x10d   : > { %v844_v25 = vsub.f32 %v3121_v37, %v788_v18  ;;  %v846_v26 = vsub.f32 %v3136_v42, %v788_v18  ;;  %v848_v27 = vsub.f32 %v3153_v48, %v788_v18  ;;  %v850_v28 = vsub.f32 %v3166_v54, %v788_v18  ;;  %v3224_v29 = vpop.f32.mrb[14].mxu0  ;;  %2452 = vmatmul.mubr.msk.f32.gmra.mrb[80].mxu0 %vm273_vm0, %v265_v35 }
 0x10e   : > { %v875_v30 = vmul.f32 1.442695, %v843_v21  ;;  %v879_v31 = vmul.f32 1.442695, %v845_v22  ;;  %v883_v32 = vmul.f32 1.442695, %v847_v23  ;;  %v791_v33 = vmax.f32 %v790_v16, %v3224_v29  ;;  %728 = vmatprep.mubr.f32.mxu0 %v4040_v0 }
 0x10f   : > { %v887_v34 = vmul.f32 1.442695, %v849_v24  ;;  %v877_v36 = vmul.f32 1.442695, %v844_v25  ;;  %v3232_v38 = vpop.f32.mrb[15].mxu0 }
 0x110   : > { %2624 = vpow2.f32 %v875_v30  ;;  %v792_v37 = vrot.slane %v791_v33, 4  ;;  %v881_v39 = vmul.f32 1.442695, %v846_v26  ;;  %v800_v40 = vmax.f32 %v799_v19, %v3232_v38 }
 0x111   : > { %2626 = vpow2.f32 %v879_v31  ;;  %v3235_v41 = vpop.f32.mrb[16].mxu0  ;;  %v885_v44 = vmul.f32 1.442695, %v848_v27  ;;  %v889_v48 = vmul.f32 1.442695, %v850_v28  ;;  %2453 = vmatmul.mubr.msk.f32.gmra.mrb[82].mxu0 %vm273_vm0, %v266_v46 }
 0x112   : > { %2628 = vpow2.f32 %v883_v32  ;;  %v793_v42 = vmax.f32 %v791_v33, %v792_v37  ;;  %v3237_v43 = vpop.f32.mrb[17].mxu0  ;;  %v801_v45 = vrot.slane %v800_v40, 4  ;;  %734 = vmatprep.mubr.f32.mxu0 %v4040_v0 }
 0x113   : > { %2630 = vpow2.f32 %v887_v34 }
 0x114   : > { %2632 = vpow2.f32 %v877_v36  ;;  %v794_v47 = vrot.slane %v793_v42, 2  ;;  %v802_v49 = vmax.f32 %v800_v40, %v801_v45 }
 0x115   : > { %2634 = vpow2.f32 %v881_v39  ;;  %v3244_v50 = vpop.f32.mrb[18].mxu0  ;;  %2454 = vmatmul.mubr.msk.f32.gmra.mrb[84].mxu0 %vm273_vm0, %v267_v56 }
 0x116   : > { %v795_v51 = vmax.f32 %v793_v42, %v794_v47  ;;  %v807_v52 = vmax.f32 %v3235_v41, %v3244_v50  ;;  %v3248_v53 = vpop.f32.mrb[19].mxu0  ;;  %2636 = vpow2.f32 %v885_v44  ;;  %v803_v54 = vrot.slane %v802_v49, 2 }
 0x117   : > { %v816_v55 = vmax.f32 %v3237_v43, %v3248_v53  ;;  %2638 = vpow2.f32 %v889_v48 }
 0x118   : > { %v796_v57 = vrot.slane %v795_v51, 1  ;;  %v804_v58 = vmax.f32 %v802_v49, %v803_v54 }
 0x119   : > { %v3257_v59 = vpop.f32.mrb[20].mxu0 }
 0x11a   : > { %v3259_v61 = vpop.eup %2624  ;;  %v797_v63 = vmax.f32 %v795_v51, %v796_v57  ;;  %v808_v1 = vmax.f32 %v807_v52, %v3257_v59  ;;  %v3262_v2 = vpop.f32.mrb[21].mxu0  ;;  %v805_v4 = vrot.slane %v804_v58, 1 }
 0x11b   : > { %v3265_v3 = vpop.eup %2626  ;;  %v817_v6 = vmax.f32 %v816_v55, %v3262_v2 }
 0x11c   : > { %v3268_v7 = vpop.eup %2628  ;;  %v939_v9 = vadd.f32 %v3265_v3, %v3259_v61  ;;  %v851_v10 = vsub.f32 %v3178_v60, %v797_v63  ;;  %v853_v11 = vsub.f32 %v3192_v5, %v797_v63  ;;  %v855_v12 = vsub.f32 %v3206_v14, %v797_v63 }
 0x11d   : > { %v3275_v13 = vpop.eup %2630  ;;  %v857_v15 = vsub.f32 %v3224_v29, %v797_v63  ;;  %v806_v16 = vmax.f32 %v804_v58, %v805_v4  ;;  %v3278_v18 = vpop.f32.mrb[22].mxu0 }
 0x11e   : > { %v3280_v19 = vpop.eup %2632  ;;  %v940_v20 = vadd.f32 %v3268_v7, %v939_v9  ;;  %v891_v21 = vmul.f32 1.442695, %v851_v10  ;;  %v895_v22 = vmul.f32 1.442695, %v853_v11  ;;  %v899_v23 = vmul.f32 1.442695, %v855_v12 }
 0x11f   : > { %v3283_v24 = vpop.eup %2634  ;;  %v903_v60 = vmul.f32 1.442695, %v857_v15  ;;  %v852_v5 = vsub.f32 %v3181_v62, %v806_v16  ;;  %v854_v14 = vsub.f32 %v3197_v8, %v806_v16  ;;  %v856_v25 = vsub.f32 %v3209_v17, %v806_v16  ;;  %v3288_v26 = vpop.f32.mrb[23].mxu0 }
 0x120   : > { %v941_v27 = vadd.f32 %v3275_v13, %v940_v20  ;;  %v948_v28 = vadd.f32 %v3283_v24, %v3280_v19  ;;  %2640 = vpow2.f32 %v891_v21  ;;  %v858_v29 = vsub.f32 %v3232_v38, %v806_v16  ;;  %v3294_v30 = vpop.eup %2636 }
 0x121   : > { %2642 = vpow2.f32 %v895_v22  ;;  %v893_v31 = vmul.f32 1.442695, %v852_v5  ;;  %v897_v32 = vmul.f32 1.442695, %v854_v14  ;;  %v3297_v17 = vpop.f32.mrb[24].mxu0  ;;  %v3299_v33 = vpop.eup %2638  ;;  %v809_v35 = vmax.f32 %v808_v1, %v3278_v18 }
 0x122   : > { %v942_v62 = vrot.slane %v941_v27, 4  ;;  %v949_v8 = vadd.f32 %v3294_v30, %v948_v28  ;;  %2644 = vpow2.f32 %v899_v23  ;;  %v901_v34 = vmul.f32 1.442695, %v856_v25  ;;  %v3303_v37 = vpop.f32.mrb[25].mxu0 }
 0x123   : > { %2646 = vpow2.f32 %v903_v60  ;;  %v818_v36 = vmax.f32 %v817_v6, %v3288_v26  ;;  %v905_v40 = vmul.f32 1.442695, %v858_v29  ;;  %v810_v42 = vrot.slane %v809_v35, 4 }
 0x124   : > { %v943_v38 = vadd.f32 %v942_v62, %v941_v27  ;;  %v950_v39 = vadd.f32 %v3299_v33, %v949_v8  ;;  %2648 = vpow2.f32 %v893_v31 }
 0x125   : > { %2650 = vpow2.f32 %v897_v32  ;;  %v819_v44 = vrot.slane %v818_v36, 4  ;;  %v3306_v45 = vpop.f32.mrb[26].mxu0  ;;  %v811_v51 = vmax.f32 %v809_v35, %v810_v42 }
 0x126   : > { %v944_v46 = vrot.slane %v943_v38, 2  ;;  %v951_v47 = vrot.slane %v950_v39, 4  ;;  %v825_v48 = vmax.f32 %v3297_v17, %v3306_v45  ;;  %v3310_v49 = vpop.f32.mrb[27].mxu0  ;;  %2652 = vpow2.f32 %v901_v34 }
 0x127   : > { %v820_v52 = vmax.f32 %v818_v36, %v819_v44  ;;  %v834_v54 = vmax.f32 %v3303_v37, %v3310_v49  ;;  %2654 = vpow2.f32 %v905_v40  ;;  %v812_v57 = vrot.slane %v811_v51, 2 }
 0x128   : > { %v945_v55 = vadd.f32 %v944_v46, %v943_v38  ;;  %v952_v56 = vadd.f32 %v951_v47, %v950_v39 }
 0x129   : > { %v821_v58 = vrot.slane %v820_v52, 2  ;;  %v3314_v63 = vpop.f32.mrb[28].mxu0  ;;  %v813_v12 = vmax.f32 %v811_v51, %v812_v57 }
 0x12a   : > { %v3316_v1 = vpop.eup %2640  ;;  %v946_v4 = vrot.slane %v945_v55, 1  ;;  %v953_v6 = vrot.slane %v952_v56, 2  ;;  %v826_v9 = vmax.f32 %v825_v48, %v3314_v63  ;;  %v3319_v10 = vpop.f32.mrb[29].mxu0 }
 0x12b   : > { %v3321_v11 = vpop.eup %2642  ;;  %v822_v15 = vmax.f32 %v820_v52, %v821_v58  ;;  %v835_v16 = vmax.f32 %v834_v54, %v3319_v10  ;;  %v814_v5 = vrot.slane %v813_v12, 1 }
 0x12c   : > { %v3324_v20 = vpop.eup %2644  ;;  %v947_v21 = vadd.f32 %v946_v4, %v945_v55  ;;  %v954_v22 = vadd.f32 %v953_v6, %v952_v56  ;;  %v957_v23 = vadd.f32 %v3321_v11, %v3316_v1 }
 0x12d   : > { %v3328_v60 = vpop.eup %2646  ;;  %v823_v14 = vrot.slane %v822_v15, 1  ;;  %v3330_v25 = vpop.f32.mrb[30].mxu0  ;;  %v815_v8 = vmax.f32 %v813_v12, %v814_v5 }
 0x12e   : > { %v3332_v27 = vpop.eup %2648  ;;  %2656 = vrcp.f32 %v947_v21  ;;  %v955_v28 = vrot.slane %v954_v22, 1  ;;  %v958_v29 = vadd.f32 %v3324_v20, %v957_v23  ;;  %v827_v31 = vmax.f32 %v826_v9, %v3330_v25  ;;  %v3336_v32 = vpop.f32.mrb[31].mxu0 }
 0x12f   : > { %v3338_v62 = vpop.eup %2650  ;;  %v824_v34 = vmax.f32 %v822_v15, %v823_v14  ;;  %v836_v35 = vmax.f32 %v835_v16, %v3336_v32  ;;  %v859_v44 = vsub.f32 %v3235_v41, %v815_v8  ;;  %v861_v46 = vsub.f32 %v3244_v50, %v815_v8 }
 0x130   : > { %v956_v36 = vadd.f32 %v955_v28, %v954_v22  ;;  %v959_v38 = vadd.f32 %v3328_v60, %v958_v29  ;;  %v966_v39 = vadd.f32 %v3338_v62, %v3332_v27  ;;  %v828_v40 = vrot.slane %v827_v31, 4  ;;  %v3344_v42 = vpop.eup %2652 }
 0x131   : > { %v863_v47 = vsub.f32 %v3257_v59, %v815_v8  ;;  %v865_v48 = vsub.f32 %v3278_v18, %v815_v8  ;;  %v3350_v51 = vpop.f32.mrb[32].mxu0  ;;  %v860_v55 = vsub.f32 %v3237_v43, %v824_v34  ;;  %v3356_v57 = vpop.eup %2654  ;;  %v907_v58 = vmul.f32 1.442695, %v859_v44 }
 0x132   : > { %2658 = vrcp.f32 %v956_v36  ;;  %v960_v52 = vrot.slane %v959_v38, 4  ;;  %v967_v54 = vadd.f32 %v3344_v42, %v966_v39  ;;  %v3354_v56 = vpop.f32.mrb[33].mxu0  ;;  %v911_v41 = vmul.f32 1.442695, %v861_v46 }
 0x133   : > { %v915_v4 = vmul.f32 1.442695, %v863_v47  ;;  %v862_v50 = vsub.f32 %v3248_v53, %v824_v34  ;;  %v919_v6 = vmul.f32 1.442695, %v865_v48  ;;  %v864_v9 = vsub.f32 %v3262_v2, %v824_v34 }
 0x134   : > { %v961_v59 = vadd.f32 %v960_v52, %v959_v38  ;;  %v968_v18 = vadd.f32 %v3356_v57, %v967_v54  ;;  %2660 = vpow2.f32 %v907_v58  ;;  %v866_v12 = vsub.f32 %v3288_v26, %v824_v34 }
 0x135   : > { %v909_v15 = vmul.f32 1.442695, %v860_v55  ;;  %v913_v43 = vmul.f32 1.442695, %v862_v50  ;;  %v3362_v16 = vpop.f32.mrb[34].mxu0  ;;  %2662 = vpow2.f32 %v911_v41  ;;  %v829_v14 = vmax.f32 %v827_v31, %v828_v40 }
 0x136   : > { %v962_v21 = vrot.slane %v961_v59, 2  ;;  %v969_v22 = vrot.slane %v968_v18, 4  ;;  %v917_v23 = vmul.f32 1.442695, %v864_v9  ;;  %v3364_v5 = vpop.f32.mrb[35].mxu0  ;;  %2664 = vpow2.f32 %v915_v4 }
 0x137   : > { %v921_v53 = vmul.f32 1.442695, %v866_v12  ;;  %v837_v28 = vrot.slane %v836_v35, 4  ;;  %2666 = vpow2.f32 %v919_v6  ;;  %v1059_v26 = vmax.f32 %v3350_v51, %v3354_v56 }
 0x138   : > { %v2657_v29 = vpop.eup %2656  ;;  %v963_v8 = vadd.f32 %v962_v21, %v961_v59  ;;  %v970_v2 = vadd.f32 %v969_v22, %v968_v18  ;;  %2668 = vpow2.f32 %v909_v15  ;;  %v830_v34 = vrot.slane %v829_v14, 2 }
 0x139   : > { %v838_v36 = vmax.f32 %v836_v35, %v837_v28  ;;  %v1062_v38 = vmax.f32 %v3362_v16, %v3364_v5  ;;  %v3370_v39 = vpop.f32.mrb[36].mxu0  ;;  %2670 = vpow2.f32 %v913_v43  ;;  %1060 = vmax.xlane.f32.xlu0 %v1059_v26  ;;  %v3375_v40 = vmul.f32 %v2657_v29, %v3259_v61 }
 0x13a   : > { %v964_v44 = vrot.slane %v963_v8, 1  ;;  %v971_v46 = vrot.slane %v970_v2, 2  ;;  %v3372_v31 = vpop.f32.mrb[37].mxu0  ;;  %2672 = vpow2.f32 %v917_v23  ;;  %v831_v47 = vmax.f32 %v829_v14, %v830_v34 }
 0x13b   : > { %v839_v48 = vrot.slane %v838_v36, 2  ;;  %v1065_v35 = vmax.f32 %v3370_v39, %v3372_v31  ;;  %2674 = vpow2.f32 %v921_v53  ;;  %v3380_v58 = vmul.f32 %v2657_v29, %v3265_v3 }
 0x13c   : > { %v2659_v52 = vpop.eup %2658  ;;  %v965_v54 = vadd.f32 %v964_v44, %v963_v8  ;;  %v972_v55 = vadd.f32 %v971_v46, %v970_v2  ;;  %v832_v41 = vrot.slane %v831_v47, 1  ;;  %v3409_v53 = vmul.f32 %v2657_v29, %v3268_v7 }
 0x13d   : > { %v840_v4 = vmax.f32 %v838_v36, %v839_v48  ;;  %1066 = vmax.xlane.f32.xlu1 %v1065_v35  ;;  %v3382_v50 = vpop.f32.mrb[38].mxu0  ;;  %v3385_v61 = vmul.f32 %v2659_v52, %v3280_v19  ;;  %v3388_v59 = vmul.f32 %v2659_v52, %v3283_v24  ;;  %1063 = vmax.xlane.f32.xlu0 %v1062_v38 }
 0x13e   : > { %2676 = vrcp.f32 %v965_v54  ;;  %v973_v18 = vrot.slane %v972_v55, 1  ;;  %v3390_v6 = vpop.f32.mrb[39].mxu0  ;;  %v3395_v9 = vmul.f32 %v2659_v52, %v3294_v30  ;;  %v3397_v12 = vpop.eup %2660  ;;  %v833_v15 = vmax.f32 %v831_v47, %v832_v41  ;;  %4078 = vst [vmem:[#allocation7_spill] sm:$0xff] %v3409_v53 }
 0x13f   : > { %v841_v43 = vrot.slane %v840_v4, 1  ;;  %v1068_v19 = vmax.f32 %v3382_v50, %v3390_v6  ;;  %v3403_v21 = vpop.eup %2662  ;;  %v3406_v23 = vmul.f32 %v2659_v52, %v3299_v33  ;;  %v3412_v30 = vmul.f32 %v2657_v29, %v3275_v13 }
 0x140   : > { %4076 = vst [vmem:[#allocation5_spill] sm:$0xff] %v3395_v9  ;;  %v974_v22 = vadd.f32 %v973_v18, %v972_v55  ;;  %v3414_v14 = vpop.eup %2664  ;;  %v975_v28 = vadd.f32 %v3403_v21, %v3397_v12  ;;  %v867_v8 = vsub.f32 %v3297_v17, %v833_v15  ;;  %v869_v2 = vsub.f32 %v3306_v45, %v833_v15 }
 0x141   : > { %4077 = vst [vmem:[#allocation6_spill] sm:$0xff] %v3406_v23  ;;  %4079 = vst [vmem:[#allocation8_spill] sm:$0xff] %v3412_v30  ;;  %v871_v26 = vsub.f32 %v3314_v63, %v833_v15  ;;  %1069 = vmax.xlane.f32.xlu1 %v1068_v19  ;;  %v3421_v33 = vpop.f32.mrb[40].mxu0  ;;  %v3423_v34 = vpop.eup %2666  ;;  %v873_v7 = vsub.f32 %v3330_v25, %v833_v15  ;;  %v842_v13 = vmax.f32 %v840_v4, %v841_v43 }
 0x142   : > { %2678 = vrcp.f32 %v974_v22  ;;  %v3426_v29 = vpop.f32.mrb[41].mxu0  ;;  %v3430_v38 = vpop.eup %2668  ;;  %v976_v17 = vadd.f32 %v3414_v14, %v975_v28  ;;  %v923_v45 = vmul.f32 1.442695, %v867_v8  ;;  %v927_v63 = vmul.f32 1.442695, %v869_v2 }
 0x143   : > { %v931_v44 = vmul.f32 1.442695, %v871_v26  ;;  %v3433_v46 = vpop.eup %2670  ;;  %v935_v47 = vmul.f32 1.442695, %v873_v7  ;;  %v868_v48 = vsub.f32 %v3303_v37, %v842_v13  ;;  %v870_v25 = vsub.f32 %v3310_v49, %v842_v13 }
 0x144   : > { %v872_v35 = vsub.f32 %v3319_v10, %v842_v13  ;;  %v3438_v52 = vpop.eup %2672  ;;  %v977_v54 = vadd.f32 %v3423_v34, %v976_v17  ;;  %v984_v55 = vadd.f32 %v3433_v46, %v3430_v38  ;;  %2680 = vpow2.f32 %v923_v45 }
 0x145   : > { %v874_v41 = vsub.f32 %v3336_v32, %v842_v13  ;;  %v3444_v4 = vpop.f32.mrb[42].mxu0  ;;  %v3446_v18 = vpop.eup %2674  ;;  %2682 = vpow2.f32 %v927_v63  ;;  %v925_v37 = vmul.f32 1.442695, %v868_v48  ;;  %v929_v15 = vmul.f32 1.442695, %v870_v25 }
 0x146   : > { %v933_v49 = vmul.f32 1.442695, %v872_v35  ;;  %v978_v43 = vrot.slane %v977_v54, 4  ;;  %v985_v10 = vadd.f32 %v3438_v52, %v984_v55  ;;  %2684 = vpow2.f32 %v931_v44  ;;  %v3449_v22 = vpop.f32.mrb[43].mxu0 }
 0x147   : > { %v937_v19 = vmul.f32 1.442695, %v874_v41  ;;  %2686 = vpow2.f32 %v935_v47  ;;  %v1071_v32 = vmax.f32 %v3421_v33, %v3426_v29  ;;  %v1074_v8 = vmax.f32 %v3444_v4, %v3449_v22 }
 0x148   : > { %v2677_v28 = vpop.eup %2676  ;;  %v979_v26 = vadd.f32 %v978_v43, %v977_v54  ;;  %v986_v7 = vadd.f32 %v3446_v18, %v985_v10  ;;  %2688 = vpow2.f32 %v925_v37 }
 0x149   : > { %v3458_v13 = vpop.f32.mrb[44].mxu0  ;;  %v3461_v17 = vmul.f32 %v2677_v28, %v3316_v1  ;;  %2690 = vpow2.f32 %v929_v15  ;;  %1072 = vmax.xlane.f32.xlu0 %v1071_v32  ;;  %1075 = vmax.xlane.f32.xlu1 %v1074_v8  ;;  %v3466_v63 = vmul.f32 %v2677_v28, %v3321_v11  ;;  %v3469_v44 = vmul.f32 %v2677_v28, %v3324_v20 }
 0x14a   : > { %v3463_v45 = vpop.f32.mrb[45].mxu0  ;;  %v3472_v47 = vmul.f32 %v2677_v28, %v3328_v60  ;;  %v980_v48 = vrot.slane %v979_v26, 2  ;;  %v987_v25 = vrot.slane %v986_v7, 4  ;;  %2692 = vpow2.f32 %v933_v49 }
 0x14b   : > { %4080 = vst [vmem:[#allocation9_spill] sm:$0xff] %v3461_v17  ;;  %4081 = vst [vmem:[#allocation10_spill] sm:$0xff] %v3466_v63  ;;  %v1077_v1 = vmax.f32 %v3458_v13, %v3463_v45  ;;  %2694 = vpow2.f32 %v937_v19 }
 0x14c   : > { %4082 = vst [vmem:[#allocation11_spill] sm:$0xff] %v3469_v44  ;;  %4083 = vst [vmem:[#allocation12_spill] sm:$0xff] %v3472_v47  ;;  %v2679_v35 = vpop.eup %2678  ;;  %v981_v55 = vadd.f32 %v980_v48, %v979_v26  ;;  %v988_v41 = vadd.f32 %v987_v25, %v986_v7 }
 0x14d   : > { %v3480_v20 = vpop.f32.mrb[46].mxu0  ;;  %v3483_v60 = vmul.f32 %v2679_v35, %v3332_v27  ;;  %v3486_v37 = vmul.f32 %v2679_v35, %v3338_v62  ;;  %1078 = vmax.xlane.f32.xlu0 %v1077_v1  ;;  %v3491_v49 = vmul.f32 %v2679_v35, %v3344_v42  ;;  %v3494_v43 = vmul.f32 %v2679_v35, %v3356_v57 }
 0x14e   : > { %v3488_v15 = vpop.f32.mrb[47].mxu0  ;;  %v3496_v10 = vpop.eup %2680  ;;  %v982_v28 = vrot.slane %v981_v55, 1  ;;  %v989_v32 = vrot.slane %v988_v41, 2 }
 0x14f   : > { %4084 = vst [vmem:[#allocation13_spill] sm:$0xff] %v3483_v60  ;;  %4085 = vst [vmem:[#allocation14_spill] sm:$0xff] %v3486_v37  ;;  %v1080_v27 = vmax.f32 %v3480_v20, %v3488_v15  ;;  %v3502_v19 = vpop.eup %2682 }
 0x150   : > { %4086 = vst [vmem:[#allocation15_spill] sm:$0xff] %v3491_v49  ;;  %4087 = vst [vmem:[#allocation16_spill] sm:$0xff] %v3494_v43  ;;  %v3506_v42 = vpop.eup %2684  ;;  %v983_v26 = vadd.f32 %v982_v28, %v981_v55  ;;  %v990_v57 = vadd.f32 %v989_v32, %v988_v41  ;;  %v993_v7 = vadd.f32 %v3502_v19, %v3496_v10 }
 0x151   : > { %1081 = vmax.xlane.f32.xlu1 %v1080_v27  ;;  %v3510_v48 = vpop.f32.mrb[48].mxu0  ;;  %v3512_v25 = vpop.eup %2686 }
 0x152   : > { %v3514_v1 = vpop.f32.mrb[49].mxu0  ;;  %v3516_v35 = vpop.eup %2688  ;;  %2696 = vrcp.f32 %v983_v26  ;;  %v991_v11 = vrot.slane %v990_v57, 1  ;;  %v994_v8 = vadd.f32 %v3506_v42, %v993_v7 }
 0x153   : > { %v1083_v55 = vmax.f32 %v3510_v48, %v3514_v1  ;;  %v3521_v41 = vpop.eup %2690 }
 0x154   : > { %v992_v28 = vadd.f32 %v991_v11, %v990_v57  ;;  %v995_v32 = vadd.f32 %v3512_v25, %v994_v8  ;;  %v1002_v27 = vadd.f32 %v3521_v41, %v3516_v35  ;;  %v3528_v0 = vpop.eup %2692 }
 0x155   : > { %1084 = vmax.xlane.f32.xlu0 %v1083_v55  ;;  %v3526_v54 = vpop.f32.mrb[50].mxu0  ;;  %v3535_v11 = vpop.eup %2694 }
 0x156   : > { %v3530_v26 = vpop.f32.mrb[51].mxu0  ;;  %2698 = vrcp.f32 %v992_v28  ;;  %v996_v7 = vrot.slane %v995_v32, 4  ;;  %v1003_v62 = vadd.f32 %v3528_v0, %v1002_v27 }
 0x157   : > { %v1086_v2 = vmax.f32 %v3526_v54, %v3530_v26 }
 0x158   : > { %v997_v8 = vadd.f32 %v996_v7, %v995_v32  ;;  %v1004_v57 = vadd.f32 %v3535_v11, %v1003_v62 }
 0x159   : > { %1087 = vmax.xlane.f32.xlu1 %v1086_v2  ;;  %v3538_v55 = vpop.f32.mrb[52].mxu0 }
 0x15a   : > { %v3540_v36 = vpop.f32.mrb[53].mxu0  ;;  %v998_v3 = vrot.slane %v997_v8, 2  ;;  %v1005_v24 = vrot.slane %v1004_v57, 4 }
 0x15b   : > { %v1089_v28 = vmax.f32 %v3538_v55, %v3540_v36 }
 0x15c   : > { %v2697_v44 = vpop.eup %2696  ;;  %v999_v27 = vadd.f32 %v998_v3, %v997_v8  ;;  %v1006_v47 = vadd.f32 %v1005_v24, %v1004_v57 }
 0x15d   : > { %1090 = vmax.xlane.f32.xlu0 %v1089_v28  ;;  %v3544_v49 = vpop.f32.mrb[54].mxu0  ;;  %v3549_v62 = vmul.f32 %v2697_v44, %v3397_v12  ;;  %v3552_v2 = vmul.f32 %v2697_v44, %v3403_v21  ;;  %v3555_v32 = vmul.f32 %v2697_v44, %v3414_v14  ;;  %v3558_v7 = vmul.f32 %v2697_v44, %v3423_v34 }
 0x15e   : > { %v3546_v43 = vpop.f32.mrb[55].mxu0  ;;  %v1000_v17 = vrot.slane %v999_v27, 1  ;;  %v1007_v3 = vrot.slane %v1006_v47, 2 }
 0x15f   : > { %4088 = vst [vmem:[#allocation17_spill] sm:$0xff] %v3549_v62  ;;  %4089 = vst [vmem:[#allocation18_spill] sm:$0xff] %v3552_v2  ;;  %v1092_v24 = vmax.f32 %v3544_v49, %v3546_v43 }
 0x160   : > { %4090 = vst [vmem:[#allocation19_spill] sm:$0xff] %v3555_v32  ;;  %4091 = vst [vmem:[#allocation20_spill] sm:$0xff] %v3558_v7  ;;  %v2699_v57 = vpop.eup %2698  ;;  %v1001_v21 = vadd.f32 %v1000_v17, %v999_v27  ;;  %v1008_v28 = vadd.f32 %v1007_v3, %v1006_v47 }
 0x161   : > { %1093 = vmax.xlane.f32.xlu1 %v1092_v24  ;;  %v3566_v14 = vpop.f32.mrb[56].mxu0  ;;  %v3571_v34 = vmul.f32 %v2699_v57, %v3430_v38  ;;  %v3574_v44 = vmul.f32 %v2699_v57, %v3433_v46  ;;  %v3577_v60 = vmul.f32 %v2699_v57, %v3438_v52  ;;  %v3580_v8 = vmul.f32 %v2699_v57, %v3446_v18 }
 0x162   : > { %v3568_v63 = vpop.f32.mrb[57].mxu0  ;;  %2700 = vrcp.f32 %v1001_v21  ;;  %v1009_v17 = vrot.slane %v1008_v28, 1 }
 0x163   : > { %4092 = vst [vmem:[#allocation21_spill] sm:$0xff] %v3571_v34  ;;  %4093 = vst [vmem:[#allocation22_spill] sm:$0xff] %v3574_v44  ;;  %v1095_v47 = vmax.f32 %v3566_v14, %v3568_v63 }
 0x164   : > { %4094 = vst [vmem:[#allocation23_spill] sm:$0xff] %v3577_v60  ;;  %4095 = vst [vmem:[#allocation24_spill] sm:$0xff] %v3580_v8  ;;  %v1010_v3 = vadd.f32 %v1009_v17, %v1008_v28 }
 0x165   : > { %1096 = vmax.xlane.f32.xlu0 %v1095_v47  ;;  %v3588_v46 = vpop.f32.mrb[58].mxu0 }
 0x166   : > { %v3590_v52 = vpop.f32.mrb[59].mxu0  ;;  %2702 = vrcp.f32 %v1010_v3 }
 0x167   : > { %v1098_v18 = vmax.f32 %v3588_v46, %v3590_v52 }
 0x169   : > { %1099 = vmax.xlane.f32.xlu1 %v1098_v18  ;;  %v3594_v24 = vpop.f32.mrb[60].mxu0 }
 0x16a   : > { %v3596_v57 = vpop.f32.mrb[61].mxu0 }
 0x16b   : > { %v1101_v21 = vmax.f32 %v3594_v24, %v3596_v57 }
 0x16c   : > { %v2701_v12 = vpop.eup %2700 }
 0x16d   : > { %1102 = vmax.xlane.f32.xlu0 %v1101_v21  ;;  %v3600_v28 = vpop.f32.mrb[62].mxu0  ;;  %v3605_v47 = vmul.f32 %v2701_v12, %v3496_v10  ;;  %v3608_v3 = vmul.f32 %v2701_v12, %v3502_v19  ;;  %v3611_v18 = vmul.f32 %v2701_v12, %v3506_v42  ;;  %v3614_v38 = vmul.f32 %v2701_v12, %v3512_v25 }
 0x16e   : > { %v3602_v17 = vpop.f32.mrb[63].mxu0 }
 0x16f   : > { %4096 = vst [vmem:[#allocation25_spill] sm:$0xff] %v3605_v47  ;;  %4097 = vst [vmem:[#allocation26_spill] sm:$0xff] %v3608_v3  ;;  %v1104_v27 = vmax.f32 %v3600_v28, %v3602_v17 }
 0x170   : > { %4098 = vst [vmem:[#allocation27_spill] sm:$0xff] %v3611_v18  ;;  %4099 = vst [vmem:[#allocation28_spill] sm:$0xff] %v3614_v38  ;;  %v2703_v10 = vpop.eup %2702 }
 0x171   : > { %1105 = vmax.xlane.f32.xlu1 %v1104_v27  ;;  %v3623_v19 = vmul.f32 %v2703_v10, %v3516_v35  ;;  %v3626_v42 = vmul.f32 %v2703_v10, %v3521_v41  ;;  %v3629_v25 = vmul.f32 %v2703_v10, %v3528_v0  ;;  %v3632_v12 = vmul.f32 %v2703_v10, %v3535_v11  ;;  %v676_v18 = vpop.f32.mrb[64].mxu0 }
 0x172   : > { %v678_v27 = vpop.f32.mrb[65].mxu0 }
 0x173   : > { %4100 = vst [vmem:[#allocation29_spill] sm:$0xff] %v3623_v19  ;;  %4101 = vst [vmem:[#allocation30_spill] sm:$0xff] %v3626_v42 }
 0x174   : > { %4102 = vst [vmem:[#allocation31_spill] sm:$0xff] %v3629_v25  ;;  %4103 = vst [vmem:[#allocation32_spill] sm:$0xff] %v3632_v12 }
 0x175   : > { %v682_v47 = vpop.f32.mrb[66].mxu0 }
 0x176   : > { %v2485_v60 = vpack.c.bf16 %v682_v47, %v676_v18  ;;  %v684_v11 = vpop.f32.mrb[67].mxu0 }
 0x177   : > { %v2483_v19 = vpack.c.bf16 %v684_v11, %v678_v27 }
 0x179   : > { %2484 = vmatprep.subr.bf16.mxu1 %v2483_v19 }
 0x17a   : > { %2486 = vmatpush1.bf16.xpose.msra.mxu1 %v2485_v60 }
 0x1c6   : > { %v1061_v38 = vpop.xlane.xlu0 %1060 }
 0x1c7   : > { %v1107_v35 = vsub.f32 %v3350_v51, %v1061_v38  ;;  %v1108_v41 = vsub.f32 %v3354_v56, %v1061_v38  ;;  %v688_v38 = vpop.f32.mrb[68].mxu0 }
 0x1c8   : > { %v690_v18 = vpop.f32.mrb[69].mxu0 }
 0x1c9   : > { %v1139_v3 = vmul.f32 1.442695, %v1107_v35  ;;  %v1141_v0 = vmul.f32 1.442695, %v1108_v41 }
 0x1ca   : > { %v1067_v7 = vpop.xlane.xlu1 %1066  ;;  %v1064_v10 = vpop.xlane.xlu0 %1063 }
 0x1cb   : > { %v1111_v8 = vsub.f32 %v3370_v39, %v1067_v7  ;;  %v1112_v21 = vsub.f32 %v3372_v31, %v1067_v7  ;;  %2704 = vpow2.f32 %v1139_v3  ;;  %v1109_v32 = vsub.f32 %v3362_v16, %v1064_v10 }
 0x1cc   : > { %v1110_v25 = vsub.f32 %v3364_v5, %v1064_v10  ;;  %2706 = vpow2.f32 %v1141_v0  ;;  %v694_v5 = vpop.f32.mrb[70].mxu0 }
 0x1cd   : > { %v1147_v51 = vmul.f32 1.442695, %v1111_v8  ;;  %v1149_v56 = vmul.f32 1.442695, %v1112_v21  ;;  %v1143_v35 = vmul.f32 1.442695, %v1109_v32  ;;  %v2489_v8 = vpack.c.bf16 %v694_v5, %v688_v38 }
 0x1ce   : > { %v1145_v41 = vmul.f32 1.442695, %v1110_v25  ;;  %v1070_v47 = vpop.xlane.xlu1 %1069  ;;  %v696_v3 = vpop.f32.mrb[71].mxu0 }
 0x1cf   : > { %2708 = vpow2.f32 %v1147_v51  ;;  %v1113_v39 = vsub.f32 %v3382_v50, %v1070_v47  ;;  %v1114_v31 = vsub.f32 %v3390_v6, %v1070_v47  ;;  %v2487_v21 = vpack.c.bf16 %v696_v3, %v690_v18 }
 0x1d0   : > { %2710 = vpow2.f32 %v1143_v35 }
 0x1d1   : > { %2712 = vpow2.f32 %v1145_v41  ;;  %v1151_v16 = vmul.f32 1.442695, %v1113_v39  ;;  %v1153_v7 = vmul.f32 1.442695, %v1114_v31  ;;  %2488 = vmatprep.subr.bf16.mxu1 %v2487_v21 }
 0x1d2   : > { %2714 = vpow2.f32 %v1149_v56  ;;  %2490 = vmatpush1.bf16.xpose.msra.mxu1 %v2489_v8 }
 0x1d3   : > { %2716 = vpow2.f32 %v1151_v16 }
 0x1d4   : > { %2718 = vpow2.f32 %v1153_v7 }
 0x1d5   : > { %v3646_v32 = vpop.eup %2704 }
 0x1d6   : > { %v3648_v60 = vpop.eup %2706  ;;  %v1073_v50 = vpop.xlane.xlu0 %1072 }
 0x1d7   : > { %v1076_v19 = vpop.xlane.xlu1 %1075  ;;  %v1115_v6 = vsub.f32 %v3421_v33, %v1073_v50  ;;  %v1116_v25 = vsub.f32 %v3426_v29, %v1073_v50  ;;  %v1203_v27 = vadd.f32 %v3648_v60, %v3646_v32 }
 0x1d8   : > { %v1117_v0 = vsub.f32 %v3444_v4, %v1076_v19  ;;  %v1118_v10 = vsub.f32 %v3449_v22, %v1076_v19 }
 0x1d9   : > { %v3655_v11 = vpop.eup %2708  ;;  %v1155_v56 = vmul.f32 1.442695, %v1115_v6  ;;  %v1157_v38 = vmul.f32 1.442695, %v1116_v25  ;;  %1204 = vadd.xlane.f32.xlu0 %v1203_v27 }
 0x1da   : > { %v3658_v51 = vpop.eup %2710  ;;  %v1159_v35 = vmul.f32 1.442695, %v1117_v0  ;;  %v1161_v33 = vmul.f32 1.442695, %v1118_v10  ;;  %v1079_v47 = vpop.xlane.xlu0 %1078 }
 0x1db   : > { %v3660_v41 = vpop.eup %2712  ;;  %2720 = vpow2.f32 %v1155_v56  ;;  %v1119_v18 = vsub.f32 %v3458_v13, %v1079_v47  ;;  %v1120_v22 = vsub.f32 %v3463_v45, %v1079_v47 }
 0x1dc   : > { %v3662_v29 = vpop.eup %2714  ;;  %v1206_v4 = vadd.f32 %v3660_v41, %v3658_v51  ;;  %2722 = vpow2.f32 %v1157_v38 }
 0x1dd   : > { %v3668_v39 = vpop.eup %2716  ;;  %v1209_v31 = vadd.f32 %v3662_v29, %v3655_v11  ;;  %2724 = vpow2.f32 %v1159_v35  ;;  %v1163_v7 = vmul.f32 1.442695, %v1119_v18  ;;  %v1165_v5 = vmul.f32 1.442695, %v1120_v22 }
 0x1de   : > { %v3672_v16 = vpop.eup %2718  ;;  %1207 = vadd.xlane.f32.xlu1 %v1206_v4  ;;  %v1082_v8 = vpop.xlane.xlu1 %1081  ;;  %2726 = vpow2.f32 %v1161_v33 }
 0x1df   : > { %1210 = vadd.xlane.f32.xlu0 %v1209_v31  ;;  %v1121_v3 = vsub.f32 %v3480_v20, %v1082_v8  ;;  %v1122_v13 = vsub.f32 %v3488_v15, %v1082_v8  ;;  %v1212_v45 = vadd.f32 %v3672_v16, %v3668_v39  ;;  %2728 = vpow2.f32 %v1163_v7 }
 0x1e0   : > { %2730 = vpow2.f32 %v1165_v5 }
 0x1e1   : > { %v1167_v21 = vmul.f32 1.442695, %v1121_v3  ;;  %v1169_v50 = vmul.f32 1.442695, %v1122_v13 }
 0x1e2   : > { %1213 = vadd.xlane.f32.xlu1 %v1212_v45  ;;  %v1085_v19 = vpop.xlane.xlu0 %1084 }
 0x1e3   : > { %2732 = vpow2.f32 %v1167_v21  ;;  %v1123_v6 = vsub.f32 %v3510_v48, %v1085_v19  ;;  %v1124_v25 = vsub.f32 %v3514_v1, %v1085_v19 }
 0x1e4   : > { %2734 = vpow2.f32 %v1169_v50  ;;  %v3710_v50 = vpop.f32.mrb[72].mxu0 }
 0x1e5   : > { %v1171_v27 = vmul.f32 1.442695, %v1123_v6  ;;  %v1173_v0 = vmul.f32 1.442695, %v1124_v25  ;;  %v3680_v20 = vpop.eup %2720 }
 0x1e6   : > { %v1088_v15 = vpop.xlane.xlu1 %1087  ;;  %v3682_v10 = vpop.eup %2722 }
 0x1e7   : > { %2736 = vpow2.f32 %v1171_v27  ;;  %v1125_v56 = vsub.f32 %v3526_v54, %v1088_v15  ;;  %v1126_v38 = vsub.f32 %v3530_v26, %v1088_v15  ;;  %v3686_v35 = vpop.eup %2724  ;;  %v1215_v48 = vadd.f32 %v3682_v10, %v3680_v20  ;;  %v702_v27 = vpop.f32.mrb[73].mxu0 }
 0x1e8   : > { %2738 = vpow2.f32 %v1173_v0  ;;  %v3690_v1 = vpop.eup %2726 }
 0x1e9   : > { %v1175_v33 = vmul.f32 1.442695, %v1125_v56  ;;  %v1177_v47 = vmul.f32 1.442695, %v1126_v38  ;;  %v3692_v4 = vpop.eup %2728  ;;  %1216 = vadd.xlane.f32.xlu0 %v1215_v48  ;;  %v1218_v18 = vadd.f32 %v3690_v1, %v3686_v35  ;;  %v3716_v56 = vpop.f32.mrb[74].mxu0 }
 0x1ea   : > { %v1091_v22 = vpop.xlane.xlu0 %1090  ;;  %v3696_v54 = vpop.eup %2730 }
 0x1eb   : > { %2740 = vpow2.f32 %v1175_v33  ;;  %v1127_v26 = vsub.f32 %v3538_v55, %v1091_v22  ;;  %v1128_v31 = vsub.f32 %v3540_v36, %v1091_v22  ;;  %1219 = vadd.xlane.f32.xlu1 %v1218_v18  ;;  %v1221_v7 = vadd.f32 %v3696_v54, %v3692_v4  ;;  %v708_v48 = vpop.f32.mrb[75].mxu0 }
 0x1ec   : > { %2742 = vpow2.f32 %v1177_v47  ;;  %v2491_v47 = vpack.c.bf16 %v708_v48, %v702_v27  ;;  %v3724_v18 = vpop.f32.mrb[76].mxu0 }
 0x1ed   : > { %v3702_v5 = vpop.eup %2732  ;;  %v1179_v8 = vmul.f32 1.442695, %v1127_v26  ;;  %v1181_v3 = vmul.f32 1.442695, %v1128_v31  ;;  %1222 = vadd.xlane.f32.xlu0 %v1221_v7  ;;  %v3728_v7 = vpop.f32.mrb[77].mxu0 }
 0x1ee   : > { %v3704_v13 = vpop.eup %2734  ;;  %v1094_v45 = vpop.xlane.xlu1 %1093  ;;  %2492 = vmatprep.subr.bf16.mxu1 %v2491_v47 }
 0x1ef   : > { %2744 = vpow2.f32 %v1179_v8  ;;  %v1129_v21 = vsub.f32 %v3544_v49, %v1094_v45  ;;  %v1130_v55 = vsub.f32 %v3546_v43, %v1094_v45  ;;  %v1224_v36 = vadd.f32 %v3704_v13, %v3702_v5  ;;  %v3732_v8 = vpop.f32.mrb[78].mxu0 }
 0x1f0   : > { %2746 = vpow2.f32 %v1181_v3 }
 0x1f1   : > { %v3712_v19 = vpop.eup %2736  ;;  %v1183_v6 = vmul.f32 1.442695, %v1129_v21  ;;  %v1185_v25 = vmul.f32 1.442695, %v1130_v55  ;;  %1225 = vadd.xlane.f32.xlu1 %v1224_v36  ;;  %v3738_v55 = vpop.f32.mrb[79].mxu0 }
 0x1f2   : > { %v3714_v0 = vpop.eup %2738  ;;  %v1097_v15 = vpop.xlane.xlu0 %1096 }
 0x1f3   : > { %2748 = vpow2.f32 %v1183_v6  ;;  %v1131_v49 = vsub.f32 %v3566_v14, %v1097_v15  ;;  %v1132_v43 = vsub.f32 %v3568_v63, %v1097_v15  ;;  %v1227_v38 = vadd.f32 %v3714_v0, %v3712_v19 }
 0x1f4   : > { %2750 = vpow2.f32 %v1185_v25 }
 0x1f5   : > { %v3726_v22 = vpop.eup %2740  ;;  %v1187_v26 = vmul.f32 1.442695, %v1131_v49  ;;  %v1189_v31 = vmul.f32 1.442695, %v1132_v43  ;;  %1228 = vadd.xlane.f32.xlu0 %v1227_v38 }
 0x1f6   : > { %v3730_v14 = vpop.eup %2742  ;;  %v1100_v63 = vpop.xlane.xlu1 %1099 }
 0x1f7   : > { %2752 = vpow2.f32 %v1187_v26  ;;  %v1133_v3 = vsub.f32 %v3588_v46, %v1100_v63  ;;  %v1134_v45 = vsub.f32 %v3590_v52, %v1100_v63  ;;  %v1230_v21 = vadd.f32 %v3730_v14, %v3726_v22 }
 0x1f8   : > { %2754 = vpow2.f32 %v1189_v31 }
 0x1f9   : > { %v3744_v25 = vpop.eup %2744  ;;  %v1191_v27 = vmul.f32 1.442695, %v1133_v3  ;;  %v1193_v15 = vmul.f32 1.442695, %v1134_v45  ;;  %1231 = vadd.xlane.f32.xlu1 %v1230_v21 }
 0x1fa   : > { %v3746_v46 = vpop.eup %2746  ;;  %v1103_v52 = vpop.xlane.xlu0 %1102 }
 0x1fb   : > { %2756 = vpow2.f32 %v1191_v27  ;;  %v1135_v49 = vsub.f32 %v3594_v24, %v1103_v52  ;;  %v1136_v43 = vsub.f32 %v3596_v57, %v1103_v52  ;;  %v1233_v38 = vadd.f32 %v3746_v46, %v3744_v25  ;;  %v3760_v57 = vpop.f32.mrb[80].mxu0 }
 0x1fc   : > { %2758 = vpow2.f32 %v1193_v15  ;;  %v3764_v52 = vpop.f32.mrb[81].mxu0 }
 0x1fd   : > { %v3752_v48 = vpop.eup %2748  ;;  %v1195_v47 = vmul.f32 1.442695, %v1135_v49  ;;  %v1197_v26 = vmul.f32 1.442695, %v1136_v43  ;;  %1234 = vadd.xlane.f32.xlu0 %v1233_v38  ;;  %v3768_v43 = vpop.f32.mrb[82].mxu0 }
 0x1fe   : > { %v3754_v31 = vpop.eup %2750  ;;  %v1106_v63 = vpop.xlane.xlu1 %1105 }
 0x1ff   : > { %2760 = vpow2.f32 %v1195_v47  ;;  %v1137_v3 = vsub.f32 %v3600_v28, %v1106_v63  ;;  %v1138_v45 = vsub.f32 %v3602_v17, %v1106_v63  ;;  %v1236_v24 = vadd.f32 %v3754_v31, %v3752_v48  ;;  %v3774_v38 = vpop.f32.mrb[83].mxu0 }
 0x200   : > { %2762 = vpow2.f32 %v1197_v26  ;;  %v3794_v47 = vpop.f32.mrb[84].mxu0 }
 0x201   : > { %v3762_v21 = vpop.eup %2752  ;;  %v1199_v27 = vmul.f32 1.442695, %v1137_v3  ;;  %v1201_v15 = vmul.f32 1.442695, %v1138_v45  ;;  %1237 = vadd.xlane.f32.xlu1 %v1236_v24  ;;  %v3802_v6 = vpop.f32.mrb[85].mxu0 }
 0x202   : > { %v3766_v49 = vpop.eup %2754 }
 0x203   : > { %2764 = vpow2.f32 %v1199_v27  ;;  %v1239_v28 = vadd.f32 %v3766_v49, %v3762_v21 }
 0x204   : > { %2766 = vpow2.f32 %v1201_v15 }
 0x205   : > { %v3778_v26 = vpop.eup %2756  ;;  %1240 = vadd.xlane.f32.xlu0 %v1239_v28  ;;  %v3796_v28 = vpop.f32.mrb[0].mxu1 }
 0x206   : > { %v3780_v63 = vpop.eup %2758  ;;  %v3804_v33 = vpop.f32.mrb[1].mxu1 }
 0x207   : > { %v1242_v3 = vadd.f32 %v3780_v63, %v3778_v26 }
 0x209   : > { %v3784_v45 = vpop.eup %2760  ;;  %1243 = vadd.xlane.f32.xlu1 %v1242_v3 }
 0x20a   : > { %4104 = vst [vmem:[#allocation33_spill] sm:$0xff] %v3784_v45  ;;  %v3786_v24 = vpop.eup %2762 }
 0x20b   : > { %4105 = vst [vmem:[#allocation34_spill] sm:$0xff] %v3786_v24  ;;  %v1245_v27 = vadd.f32 %v3786_v24, %v3784_v45 }
 0x20d   : > { %v3790_v15 = vpop.eup %2764  ;;  %1246 = vadd.xlane.f32.xlu0 %v1245_v27  ;;  %v3808_v27 = vpop.f32.mrb[2].mxu1 }
 0x20e   : > { %4106 = vst [vmem:[#allocation35_spill] sm:$0xff] %v3790_v15  ;;  %v3792_v17 = vpop.eup %2766  ;;  %v3810_v42 = vpop.f32.mrb[3].mxu1 }
 0x20f   : > { %4107 = vst [vmem:[#allocation36_spill] sm:$0xff] %v3792_v17  ;;  %v1248_v36 = vadd.f32 %v3792_v17, %v3790_v15  ;;  %v3812_v62 = vpop.f32.mrb[4].mxu1  ;;  %v4108_v17 = vpack.c.bf16 %v3716_v56, %v3710_v50 }
 0x210   : > { %v3816_v34 = vpop.f32.mrb[5].mxu1 }
 0x211   : > { %1249 = vadd.xlane.f32.xlu1 %v1248_v36  ;;  %v3820_v44 = vpop.f32.mrb[6].mxu1 }
 0x212   : > { %v3822_v15 = vpop.f32.mrb[7].mxu1 }
 0x213   : > { %v3824_v12 = vpop.f32.mrb[8].mxu1 }
 0x214   : > { %v3828_v37 = vpop.f32.mrb[9].mxu1 }
 0x266   : > { %v1205_v2 = vpop.xlane.xlu0 %1204 }
 0x267   : > { %2768 = vrcp.f32 %v1205_v2 }
 0x26b   : > { %v1208_v53 = vpop.xlane.xlu1 %1207 }
 0x26c   : > { %2770 = vrcp.f32 %v1208_v53  ;;  %v1211_v30 = vpop.xlane.xlu0 %1210 }
 0x26d   : > { %2772 = vrcp.f32 %v1211_v30 }
 0x26f   : > { %v1214_v3 = vpop.xlane.xlu1 %1213 }
 0x270   : > { %2774 = vrcp.f32 %v1214_v3  ;;  %v4109_v3 = vpack.c.bf16 %v3738_v55, %v3728_v7  ;;  %v4110_v7 = vpack.c.bf16 %v3732_v8, %v3724_v18 }
 0x271   : > { %v2769_v45 = vpop.eup %2768 }
 0x272   : > { %v1283_v9 = vmul.f32 %v2769_v45, %v3646_v32  ;;  %v1284_v23 = vmul.f32 %v2769_v45, %v3648_v60 }
 0x274   : > { %1379 = vmatprep.mubr.f32.mxu1 %v1284_v23 }
 0x275   : > { %1380 = vmatmul.mubr.f32.vlgmr.msra.gmra.mrb[10].mxu1 %v1283_v9 }
 0x276   : > { %v2771_v36 = vpop.eup %2770  ;;  %2494 = vmatpush1.bf16.xpose.msra.mxu1 %v4108_v17  ;;  %v1217_v2 = vpop.xlane.xlu0 %1216 }
 0x277   : > { %v2773_v24 = vpop.eup %2772  ;;  %v1286_v53 = vmul.f32 %v2771_v36, %v3660_v41  ;;  %v1285_v30 = vmul.f32 %v2771_v36, %v3658_v51  ;;  %2776 = vrcp.f32 %v1217_v2  ;;  %2496 = vmatprep.subr.bf16.mxu1 %v4109_v3 }
 0x278   : > { %v1288_v32 = vmul.f32 %v2773_v24, %v3662_v29  ;;  %v1220_v23 = vpop.xlane.xlu1 %1219  ;;  %v1287_v60 = vmul.f32 %v2773_v24, %v3655_v11  ;;  %v4111_v29 = vpack.c.bf16 %v3774_v38, %v3764_v52  ;;  %v4112_v52 = vpack.c.bf16 %v3768_v43, %v3760_v57 }
 0x279   : > { %1384 = vmatprep.mubr.f32.mxu1 %v1286_v53  ;;  %2778 = vrcp.f32 %v1220_v23 }
 0x27a   : > { %v2775_v9 = vpop.eup %2774  ;;  %1385 = vmatmul.mubr.f32.gmra.mrb[12].mxu1 %v1285_v30  ;;  %v1223_v50 = vpop.xlane.xlu0 %1222 }
 0x27b   : > { %1389 = vmatprep.mubr.f32.mxu1 %v1288_v32  ;;  %v1290_v41 = vmul.f32 %v2775_v9, %v3672_v16  ;;  %2780 = vrcp.f32 %v1223_v50  ;;  %v1289_v51 = vmul.f32 %v2775_v9, %v3668_v39  ;;  %v4125_v50 = vld [vmem:[#allocation33_spill] sm:$0xff] }
 0x27e   : > { %1390 = vmatmul.mubr.f32.gmra.mrb[14].mxu1 %v1287_v60  ;;  %v1226_v56 = vpop.xlane.xlu1 %1225 }
 0x27f   : > { %2498 = vmatpush1.bf16.xpose.msra.mxu1 %v4110_v7  ;;  %1394 = vmatprep.mubr.f32.mxu1 %v1290_v41  ;;  %2782 = vrcp.f32 %v1226_v56 }
 0x280   : > { %2500 = vmatprep.subr.bf16.mxu1 %v4111_v29 }
 0x281   : > { %v2777_v11 = vpop.eup %2776 }
 0x282   : > { %1395 = vmatmul.mubr.f32.gmra.mrb[16].mxu1 %v1289_v51  ;;  %v1229_v55 = vpop.xlane.xlu0 %1228  ;;  %v1291_v16 = vmul.f32 %v2777_v11, %v3680_v20  ;;  %v1292_v17 = vmul.f32 %v2777_v11, %v3682_v10  ;;  %v4113_v10 = vpack.c.bf16 %v3804_v33, %v3802_v6  ;;  %v4127_v51 = vld [vmem:[#allocation7_spill] sm:$0xff] }
 0x283   : > { %2784 = vrcp.f32 %v1229_v55  ;;  %v2779_v39 = vpop.eup %2778  ;;  %v4133_v11 = vld [vmem:[#allocation35_spill] sm:$0xff] }
 0x284   : > { %1464 = vmatprep.mubr.f32.mxu1 %v1292_v17  ;;  %v1294_v45 = vmul.f32 %v2779_v39, %v3690_v1  ;;  %v1293_v8 = vmul.f32 %v2779_v39, %v3686_v35 }
 0x285   : > { %v2781_v18 = vpop.eup %2780 }
 0x286   : > { %1465 = vmatmul.mubr.f32.vlgmr.msra.gmra.mrb[18].mxu1 %v1291_v16  ;;  %v1232_v24 = vpop.xlane.xlu1 %1231  ;;  %v1296_v20 = vmul.f32 %v2781_v18, %v3696_v54  ;;  %v1295_v1 = vmul.f32 %v2781_v18, %v3692_v4  ;;  %v4114_v54 = vpack.c.bf16 %v3796_v28, %v3794_v47  ;;  %v4115_v4 = vpack.c.bf16 %v3816_v34, %v3810_v42 }
 0x287   : > { %2502 = vmatpush1.bf16.xpose.msra.mxu1 %v4112_v52  ;;  %1469 = vmatprep.mubr.f32.mxu1 %v1294_v45  ;;  %2786 = vrcp.f32 %v1232_v24  ;;  %v4117_v42 = vpack.c.bf16 %v3828_v37, %v3822_v15  ;;  %v4134_v16 = vmov 0.0  }
 0x288   : > { %2504 = vmatprep.subr.bf16.mxu1 %v4113_v10 }
 0x289   : > { %v2783_v38 = vpop.eup %2782 }
 0x28a   : > { %1470 = vmatmul.mubr.f32.gmra.mrb[20].mxu1 %v1293_v8  ;;  %v1235_v36 = vpop.xlane.xlu0 %1234  ;;  %v1298_v35 = vmul.f32 %v2783_v38, %v3704_v13  ;;  %v1297_v57 = vmul.f32 %v2783_v38, %v3702_v5 }
 0x28b   : > { %1474 = vmatprep.mubr.f32.mxu1 %v1296_v20  ;;  %2788 = vrcp.f32 %v1235_v36 }
 0x28d   : > { %v2785_v2 = vpop.eup %2784 }
 0x28e   : > { %1475 = vmatmul.mubr.f32.gmra.mrb[22].mxu1 %v1295_v1  ;;  %v1238_v43 = vpop.xlane.xlu1 %1237  ;;  %v1300_v33 = vmul.f32 %v2785_v2, %v3714_v0  ;;  %v1299_v13 = vmul.f32 %v2785_v2, %v3712_v19  ;;  %v4116_v0 = vpack.c.bf16 %v3812_v62, %v3808_v27 }
 0x28f   : > { %2506 = vmatpush1.bf16.xpose.msra.mxu1 %v4114_v54  ;;  %1479 = vmatprep.mubr.f32.mxu1 %v1298_v35  ;;  %2790 = vrcp.f32 %v1238_v43 }
 0x290   : > { %2508 = vmatprep.subr.bf16.mxu1 %v4115_v4 }
 0x291   : > { %v2787_v6 = vpop.eup %2786 }
 0x292   : > { %1480 = vmatmul.mubr.f32.gmra.mrb[24].mxu1 %v1297_v57  ;;  %v1241_v53 = vpop.xlane.xlu0 %1240  ;;  %v1302_v5 = vmul.f32 %v2787_v6, %v3730_v14  ;;  %v1301_v47 = vmul.f32 %v2787_v6, %v3726_v22 }
 0x293   : > { %1549 = vmatprep.mubr.f32.mxu1 %v1300_v33  ;;  %2792 = vrcp.f32 %v1241_v53 }
 0x295   : > { %v2789_v30 = vpop.eup %2788 }
 0x296   : > { %1550 = vmatmul.mubr.f32.vlgmr.msra.gmra.mrb[26].mxu1 %v1299_v13  ;;  %v1244_v28 = vpop.xlane.xlu1 %1243  ;;  %v1304_v34 = vmul.f32 %v2789_v30, %v3746_v46  ;;  %v1303_v14 = vmul.f32 %v2789_v30, %v3744_v25  ;;  %v4118_v46 = vpack.c.bf16 %v3824_v12, %v3820_v44  ;;  %v4119_v25 = vpack.c.bf16 %v3388_v59, %v3385_v61  ;;  %v4122_v61 = vld [vmem:[#allocation6_spill] sm:$0xff]  ;;  %v4123_v59 = vld [vmem:[#allocation5_spill] sm:$0xff] }
 0x297   : > { %2510 = vmatpush1.bf16.xpose.msra.mxu1 %v4116_v0  ;;  %1554 = vmatprep.mubr.f32.mxu1 %v1302_v5  ;;  %2794 = vrcp.f32 %v1244_v28  ;;  %v4120_v12 = vpack.c.bf16 %v3380_v58, %v3375_v40  ;;  %v4124_v60 = vpack.c.bf16 %v4122_v61, %v4123_v59  ;;  %v4130_v40 = vld [vmem:[#allocation14_spill] sm:$0xff]  ;;  %v4131_v58 = vld [vmem:[#allocation13_spill] sm:$0xff] }
 0x298   : > { %2512 = vmatprep.subr.bf16.mxu1 %v4117_v42  ;;  %v4132_v29 = vpack.c.bf16 %v4130_v40, %v4131_v58  ;;  %v4144_v58 = vld [vmem:[#allocation22_spill] sm:$0xff] }
 0x299   : > { %v2791_v19 = vpop.eup %2790 }
 0x29a   : > { %1555 = vmatmul.mubr.f32.gmra.mrb[28].mxu1 %v1301_v47  ;;  %v1247_v3 = vpop.xlane.xlu0 %1246  ;;  %v1306_v22 = vmul.f32 %v2791_v19, %v3754_v31  ;;  %v1305_v62 = vmul.f32 %v2791_v19, %v3752_v48 }
 0x29b   : > { %1559 = vmatprep.mubr.f32.mxu1 %v1304_v34  ;;  %2796 = vrcp.f32 %v1247_v3 }
 0x29d   : > { %v2793_v32 = vpop.eup %2792 }
 0x29e   : > { %1560 = vmatmul.mubr.f32.gmra.mrb[30].mxu1 %v1303_v14  ;;  %v1250_v27 = vpop.xlane.xlu1 %1249  ;;  %v1308_v37 = vmul.f32 %v2793_v32, %v3766_v49  ;;  %v1307_v31 = vmul.f32 %v2793_v32, %v3762_v21  ;;  %v4121_v49 = vld [vmem:[#allocation34_spill] sm:$0xff] }
 0x29f   : > { %2514 = vmatpush1.bf16.xpose.msra.mxu1 %v4118_v46  ;;  %1564 = vmatprep.mubr.f32.mxu1 %v1306_v22  ;;  %2798 = vrcp.f32 %v1250_v27 }
 0x2a0   : > { %2516 = vmatprep.subr.bf16.mxu1 %v4119_v25 }
 0x2a1   : > { %v2795_v15 = vpop.eup %2794 }
 0x2a2   : > { %1565 = vmatmul.mubr.f32.gmra.mrb[32].mxu1 %v1305_v62  ;;  %v1310_v48 = vmul.f32 %v2795_v15, %v3780_v63  ;;  %v1309_v44 = vmul.f32 %v2795_v15, %v3778_v26  ;;  %v4126_v63 = vld [vmem:[#allocation8_spill] sm:$0xff] }
 0x2a3   : > { %1634 = vmatprep.mubr.f32.mxu1 %v1308_v37  ;;  %v4128_v56 = vpack.c.bf16 %v4126_v63, %v4127_v51  ;;  %v4129_v26 = vld [vmem:[#allocation36_spill] sm:$0xff]  ;;  %v4139_v63 = vld [vmem:[#allocation15_spill] sm:$0xff] }
 0x2a5   : > { %v2797_v23 = vpop.eup %2796 }
 0x2a6   : > { %1635 = vmatmul.mubr.f32.vlgmr.msra.gmra.mrb[34].mxu1 %v1307_v31  ;;  %v1312_v9 = vmul.f32 %v2797_v23, %v4121_v49  ;;  %v1311_v41 = vmul.f32 %v2797_v23, %v4125_v50 }
 0x2a7   : > { %2518 = vmatpush1.bf16.msra.mxu1 %v4120_v12  ;;  %1639 = vmatprep.mubr.f32.mxu1 %v1310_v48 }
 0x2a8   : > { %2520 = vmatprep.subr.bf16.mxu1 %v4124_v60  ;;  %v4135_v60 = vld [vmem:[#allocation10_spill] sm:$0xff] }
 0x2a9   : > { %v2799_v21 = vpop.eup %2798 }
 0x2aa   : > { %1640 = vmatmul.mubr.f32.gmra.mrb[36].mxu1 %v1309_v44  ;;  %v1314_v7 = vmul.f32 %v2799_v21, %v4129_v26  ;;  %v1313_v55 = vmul.f32 %v2799_v21, %v4133_v11  ;;  %v4136_v21 = vld [vmem:[#allocation9_spill] sm:$0xff]  ;;  %v4141_v26 = vld [vmem:[#allocation12_spill] sm:$0xff] }
 0x2ab   : > { %2522 = vmatpush1.bf16.msra.mxu1 %v4128_v56  ;;  %1644 = vmatprep.mubr.f32.mxu1 %v1312_v9  ;;  %v4137_v50 = vpack.c.bf16 %v4135_v60, %v4136_v21 }
 0x2ac   : > { %2524 = vmatprep.subr.bf16.mxu1 %v4132_v29  ;;  %v4145_v29 = vld [vmem:[#allocation21_spill] sm:$0xff] }
 0x2ad   : > { %v4146_v11 = vpack.c.bf16 %v4144_v58, %v4145_v29 }
 0x2ae   : > { %1645 = vmatmul.mubr.f32.gmra.mrb[38].mxu1 %v1311_v41  ;;  %v4138_v41 = vld [vmem:[#allocation16_spill] sm:$0xff] }
 0x2af   : > { %1649 = vmatprep.mubr.f32.mxu1 %v1314_v7  ;;  %v4140_v51 = vpack.c.bf16 %v4138_v41, %v4139_v63  ;;  %v4142_v7 = vld [vmem:[#allocation11_spill] sm:$0xff] }
 0x2b0   : > { %v4143_v40 = vpack.c.bf16 %v4141_v26, %v4142_v7 }
 0x2b2   : > { %1650 = vmatmul.mubr.f32.gmra.mrb[40].mxu1 %v1313_v55 }
 0x2b3   : > { %1780 = vmatprep.mubr.f32.mxu1 %v4134_v16 }
 0x348   : > { %v1381_v17 = vpop.f32.mrb[10].mxu1 }
 0x349   : > { %v1655_v39 = vmul.f32 0.00069053395, %v1381_v17  ;;  %v1383_v45 = vpop.f32.mrb[11].mxu1 }
 0x34a   : > { %v4147_v45 = vld [vmem:[#allocation18_spill] sm:$0xff] }
 0x34b   : > { %1671 = vxpose.xlu0.b32.start [1/4] (short) (narrow) %v1655_v39, 32 }
 0x34d   : > { %v1386_v18 = vpop.f32.mrb[12].mxu1 }
 0x34e   : > { %v1656_v8 = vmul.f32 0.00069053395, %v1386_v18  ;;  %v1388_v24 = vpop.f32.mrb[13].mxu1  ;;  %v4148_v18 = vld [vmem:[#allocation17_spill] sm:$0xff] }
 0x34f   : > { %v4150_v24 = vld [vmem:[#allocation24_spill] sm:$0xff] }
 0x350   : > { %1672 = vxpose.xlu0.b32.cont [2/4] (short) (narrow) %v1656_v8, 32  ;;  %v4149_v8 = vpack.c.bf16 %v4147_v45, %v4148_v18 }
 0x351   : > { %v1391_v52 = vpop.f32.mrb[14].mxu1 }
 0x352   : > { %v1657_v20 = vmul.f32 0.00069053395, %v1391_v52  ;;  %v1393_v10 = vpop.f32.mrb[15].mxu1  ;;  %v4151_v52 = vld [vmem:[#allocation23_spill] sm:$0xff] }
 0x354   : > { %1673 = vxpose.xlu0.b32.cont [3/4] (short) (narrow) %v1657_v20, 32  ;;  %v4152_v20 = vpack.c.bf16 %v4150_v24, %v4151_v52 }
 0x355   : > { %v1396_v38 = vpop.f32.mrb[16].mxu1 }
 0x356   : > { %v1658_v1 = vmul.f32 0.00069053395, %v1396_v38  ;;  %v1398_v36 = vpop.f32.mrb[17].mxu1  ;;  %v4153_v38 = vld [vmem:[#allocation20_spill] sm:$0xff] }
 0x358   : > { %1674 = vxpose.xlu0.b32.end [4/4] (short) (narrow) %v1658_v1, 32  ;;  %v4154_v1 = vld [vmem:[#allocation19_spill] sm:$0xff] }
 0x359   : > { %v1466_v35 = vpop.f32.mrb[18].mxu1  ;;  %v4155_v36 = vpack.c.bf16 %v4153_v38, %v4154_v1 }
 0x35a   : > { %v1659_v2 = vmul.f32 0.00069053395, %v1466_v35  ;;  %v1468_v57 = vpop.f32.mrb[19].mxu1  ;;  %v4156_v35 = vld [vmem:[#allocation30_spill] sm:$0xff] }
 0x35c   : > { %1805 = vxpose.xlu1.b32.start [1/4] (short) (narrow) %v1659_v2, 32  ;;  %v4157_v2 = vld [vmem:[#allocation29_spill] sm:$0xff] }
 0x35d   : > { %v1471_v43 = vpop.f32.mrb[20].mxu1  ;;  %v4158_v57 = vpack.c.bf16 %v4156_v35, %v4157_v2 }
 0x35e   : > { %v1660_v54 = vmul.f32 0.00069053395, %v1471_v43  ;;  %v1473_v33 = vpop.f32.mrb[21].mxu1 }
 0x360   : > { %1806 = vxpose.xlu1.b32.cont [2/4] (short) (narrow) %v1660_v54, 32 }
 0x361   : > { %v1476_v4 = vpop.f32.mrb[22].mxu1 }
 0x362   : > { %v1661_v6 = vmul.f32 0.00069053395, %v1476_v4  ;;  %v1478_v13 = vpop.f32.mrb[23].mxu1  ;;  %v4159_v4 = vld [vmem:[#allocation26_spill] sm:$0xff] }
 0x364   : > { %1807 = vxpose.xlu1.b32.cont [3/4] (short) (narrow) %v1661_v6, 32  ;;  %v4160_v6 = vld [vmem:[#allocation25_spill] sm:$0xff] }
 0x365   : > { %v1481_v53 = vpop.f32.mrb[24].mxu1  ;;  %v4161_v13 = vpack.c.bf16 %v4159_v4, %v4160_v6 }
 0x366   : > { %v1662_v5 = vmul.f32 0.00069053395, %v1481_v53  ;;  %v1483_v30 = vpop.f32.mrb[25].mxu1  ;;  %v4162_v53 = vld [vmem:[#allocation32_spill] sm:$0xff] }
 0x368   : > { %1808 = vxpose.xlu1.b32.end [4/4] (short) (narrow) %v1662_v5, 32  ;;  %v4163_v5 = vld [vmem:[#allocation31_spill] sm:$0xff] }
 0x369   : > { %v1551_v47 = vpop.f32.mrb[26].mxu1  ;;  %v4164_v30 = vpack.c.bf16 %v4162_v53, %v4163_v5  ;;  %v2204_v53 = vld [vmem:[%s4036_s2] sm:$0xff] }
 0x36a   : > { %v1663_v28 = vmul.f32 0.00069053395, %v1551_v47  ;;  %v1553_v0 = vpop.f32.mrb[27].mxu1 }
 0x36b   : > { %v4166_v0 = vld [vmem:[#allocation27_spill] sm:$0xff] }
 0x36c   : > { %1938 = vxpose.xlu0.b32.start [1/4] (short) (narrow) %v1663_v28, 32  ;;  %v4165_v28 = vld [vmem:[#allocation28_spill] sm:$0xff] }
 0x36d   : > { %v1556_v34 = vpop.f32.mrb[28].mxu1 }
 0x36e   : > { %v1664_v42 = vmul.f32 0.00069053395, %v1556_v34  ;;  %v1558_v19 = vpop.f32.mrb[29].mxu1  ;;  %v4167_v34 = vpack.c.bf16 %v4165_v28, %v4166_v0 }
 0x370   : > { %1939 = vxpose.xlu0.b32.cont [2/4] (short) (narrow) %v1664_v42, 32 }
 0x371   : > { %v1561_v14 = vpop.f32.mrb[30].mxu1 }
 0x372   : > { %v1665_v3 = vmul.f32 0.00069053395, %v1561_v14  ;;  %v1563_v22 = vpop.f32.mrb[31].mxu1 }
 0x374   : > { %1940 = vxpose.xlu0.b32.cont [3/4] (short) (narrow) %v1665_v3, 32 }
 0x375   : > { %v1566_v32 = vpop.f32.mrb[32].mxu1 }
 0x376   : > { %v1666_v62 = vmul.f32 0.00069053395, %v1566_v32  ;;  %v1568_v27 = vpop.f32.mrb[33].mxu1 }
 0x377   : > { %v2321_v27 = vld [vmem:[%s4038_s4] sm:$0xff] }
 0x378   : > { %1941 = vxpose.xlu0.b32.end [4/4] (short) (narrow) %v1666_v62, 32  ;;  %v2205_v62 = vld [vmem:[%s4037_s3] sm:$0xff] }
 0x379   : > { %v1636_v46 = vpop.f32.mrb[34].mxu1 }
 0x37a   : > { %v1667_v37 = vmul.f32 0.00069053395, %v1636_v46  ;;  %v1638_v25 = vpop.f32.mrb[35].mxu1  ;;  %v2869_v46 = vmov 0  }
 0x37c   : > { %2071 = vxpose.xlu1.b32.start [1/4] (short) (narrow) %v1667_v37, 32 }
 0x37d   : > { %v1641_v15 = vpop.f32.mrb[36].mxu1 }
 0x37e   : > { %v1668_v31 = vmul.f32 0.00069053395, %v1641_v15  ;;  %v1643_v48 = vpop.f32.mrb[37].mxu1 }
 0x380   : > { %2072 = vxpose.xlu1.b32.cont [2/4] (short) (narrow) %v1668_v31, 32 }
 0x381   : > { %v1646_v23 = vpop.f32.mrb[38].mxu1 }
 0x382   : > { %v1669_v44 = vmul.f32 0.00069053395, %v1646_v23  ;;  %v1648_v12 = vpop.f32.mrb[39].mxu1 }
 0x384   : > { %2073 = vxpose.xlu1.b32.cont [3/4] (short) (narrow) %v1669_v44, 32 }
 0x385   : > { %v1651_v49 = vpop.f32.mrb[40].mxu1 }
 0x386   : > { %v1670_v9 = vmul.f32 0.00069053395, %v1651_v49  ;;  %v1653_v61 = vpop.f32.mrb[41].mxu1 }
 0x388   : > { %2074 = vxpose.xlu1.b32.end [4/4] (short) (narrow) %v1670_v9, 32 }
 0x3a1   : > { %2622 = vset.pattern.permute.xlu0 %v2869_v46 }
 0x3a2   : > { %2208 = vperm.xlu0 %2622, %v2205_v62  }
 0x3a6   : > { %2623 = vset.pattern.permute.xlu1 %v2869_v46 }
 0x3a7   : > { %2324 = vperm.xlu1 %2623, %v2321_v27  }
 0x3cc   : > { %v1687_v59 = vpop.trf.xlu0 }
 0x3cd   : > { %2460 = vmatmul.mubr.msk.f32.vlgmr.msra.gmra.mrb[42].mxu1 %vm1703_vm1, %v1687_v59 }
 0x3ce   : > { %2526 = vmatpush1.bf16.msra.mxu1 %v4137_v50  ;;  %1786 = vmatprep.mubr.f32.mxu1 %v4134_v16 }
 0x3cf   : > { %2528 = vmatprep.subr.bf16.mxu1 %v4140_v51 }
 0x3d0   : > { %v1688_v56 = vpop.trf.xlu0 }
 0x3d1   : > { %2461 = vmatmul.mubr.msk.f32.gmra.mrb[44].mxu1 %vm1703_vm1, %v1688_v56 }
 0x3d2   : > { %2530 = vmatpush1.bf16.msra.mxu1 %v4143_v40  ;;  %1792 = vmatprep.mubr.f32.mxu1 %v4134_v16 }
 0x3d3   : > { %2532 = vmatprep.subr.bf16.mxu1 %v4146_v11 }
 0x3d4   : > { %v1689_v55 = vpop.trf.xlu0 }
 0x3d5   : > { %2462 = vmatmul.mubr.msk.f32.gmra.mrb[46].mxu1 %vm1703_vm1, %v1689_v55 }
 0x3d6   : > { %1798 = vmatprep.mubr.f32.mxu1 %v4134_v16 }
 0x3d8   : > { %v1690_v17 = vpop.trf.xlu0 }
 0x3d9   : > { %2463 = vmatmul.mubr.msk.f32.gmra.mrb[48].mxu1 %vm1703_vm1, %v1690_v17 }
 0x3da   : > { %1913 = vmatprep.mubr.f32.mxu1 %v4134_v16 }
 0x3dc   : > { %v1821_v39 = vpop.trf.xlu1 }
 0x3dd   : > { %2464 = vmatmul.mubr.msk.f32.vlgmr.msra.gmra.mrb[50].mxu1 %vm1703_vm1, %v1821_v39 }
 0x3de   : > { %2534 = vmatpush1.bf16.msra.mxu1 %v4149_v8  ;;  %1919 = vmatprep.mubr.f32.mxu1 %v4134_v16 }
 0x3df   : > { %2536 = vmatprep.subr.bf16.mxu1 %v4152_v20 }
 0x3e0   : > { %v1822_v10 = vpop.trf.xlu1 }
 0x3e1   : > { %2465 = vmatmul.mubr.msk.f32.gmra.mrb[52].mxu1 %vm1703_vm1, %v1822_v10 }
 0x3e2   : > { %2538 = vmatpush1.bf16.msra.mxu1 %v4155_v36  ;;  %1925 = vmatprep.mubr.f32.mxu1 %v4134_v16 }
 0x3e3   : > { %2540 = vmatprep.subr.bf16.mxu1 %v4158_v57 }
 0x3e4   : > { %v1823_v43 = vpop.trf.xlu1 }
 0x3e5   : > { %2466 = vmatmul.mubr.msk.f32.gmra.mrb[54].mxu1 %vm1703_vm1, %v1823_v43 }
 0x3e6   : > { %1931 = vmatprep.mubr.f32.mxu1 %v4134_v16 }
 0x3e8   : > { %v1824_v54 = vpop.trf.xlu1 }
 0x3e9   : > { %2467 = vmatmul.mubr.msk.f32.gmra.mrb[56].mxu1 %vm1703_vm1, %v1824_v54 }
 0x3ea   : > { %2046 = vmatprep.mubr.f32.mxu1 %v4134_v16 }
 0x3ec   : > { %v1954_v33 = vpop.trf.xlu0 }
 0x3ed   : > { %2468 = vmatmul.mubr.msk.f32.vlgmr.msra.gmra.mrb[58].mxu1 %vm1703_vm1, %v1954_v33 }
 0x3ee   : > { %2542 = vmatpush1.bf16.msra.mxu1 %v4161_v13  ;;  %2052 = vmatprep.mubr.f32.mxu1 %v4134_v16 }
 0x3ef   : > { %2544 = vmatprep.subr.bf16.mxu1 %v4164_v30 }
 0x3f0   : > { %v1955_v47 = vpop.trf.xlu0 }
 0x3f1   : > { %2469 = vmatmul.mubr.msk.f32.gmra.mrb[60].mxu1 %vm1703_vm1, %v1955_v47 }
 0x3f2   : > { %2546 = vmatpush1.bf16.msra.mxu1 %v4167_v34  ;;  %2058 = vmatprep.mubr.f32.mxu1 %v4134_v16 }
 0x3f4   : > { %v1956_v42 = vpop.trf.xlu0 }
 0x3f5   : > { %2470 = vmatmul.mubr.msk.f32.gmra.mrb[62].mxu1 %vm1703_vm1, %v1956_v42 }
 0x3f6   : > { %2064 = vmatprep.mubr.f32.mxu1 %v4134_v16 }
 0x3f8   : > { %v1957_v19 = vpop.trf.xlu0 }
 0x3f9   : > { %2471 = vmatmul.mubr.msk.f32.gmra.mrb[64].mxu1 %vm1703_vm1, %v1957_v19 }
 0x3fa   : > { %2179 = vmatprep.mubr.f32.mxu1 %v4134_v16 }
 0x3fc   : > { %v2087_v14 = vpop.trf.xlu1 }
 0x3fd   : > { %2472 = vmatmul.mubr.msk.f32.vlgmr.msra.gmra.mrb[66].mxu1 %vm1703_vm1, %v2087_v14 }
 0x3fe   : > { %2185 = vmatprep.mubr.f32.mxu1 %v4134_v16 }
 0x400   : > { %v2088_v3 = vpop.trf.xlu1 }
 0x401   : > { %2473 = vmatmul.mubr.msk.f32.gmra.mrb[68].mxu1 %vm1703_vm1, %v2088_v3 }
 0x402   : > { %2191 = vmatprep.mubr.f32.mxu1 %v4134_v16 }
 0x404   : > { %v2089_v22 = vpop.trf.xlu1 }
 0x405   : > { %2474 = vmatmul.mubr.msk.f32.gmra.mrb[70].mxu1 %vm1703_vm1, %v2089_v22 }
 0x406   : > { %2197 = vmatprep.mubr.f32.mxu1 %v4134_v16 }
 0x408   : > { %v2090_v32 = vpop.trf.xlu1 }
 0x409   : > { %2475 = vmatmul.mubr.msk.f32.gmra.mrb[72].mxu1 %vm1703_vm1, %v2090_v32 }
 0x40a   : > { %2275 = vmatprep.mubr.f32.mxu1 %v4134_v16 }
 0x421   : > { %v2209_v5 = vpop.permute.xlu0 %2208 }
 0x4a0   : > { %v1782_v37 = vpop.f32.mrb[42].mxu1 }
 0x4a1   : > { %v1784_v25 = vpop.f32.mrb[43].mxu1 }
 0x4a4   : > { %v1788_v15 = vpop.f32.mrb[44].mxu1 }
 0x4a5   : > { %v2549_v31 = vpack.c.bf16 %v1788_v15, %v1782_v37  ;;  %v1790_v48 = vpop.f32.mrb[45].mxu1 }
 0x4a6   : > { %v2547_v23 = vpack.c.bf16 %v1790_v48, %v1784_v25 }
 0x4a8   : > { %v1794_v16 = vpop.f32.mrb[46].mxu1  ;;  %2548 = vmatprep.subr.bf16.mxu1 %v2547_v23 }
 0x4a9   : > { %v1796_v44 = vpop.f32.mrb[47].mxu1  ;;  %2550 = vmatpush1.bf16.msra.mxu1 %v2549_v31 }
 0x4ac   : > { %v1800_v12 = vpop.f32.mrb[48].mxu1 }
 0x4ad   : > { %v2553_v49 = vpack.c.bf16 %v1800_v12, %v1794_v16  ;;  %v1802_v9 = vpop.f32.mrb[49].mxu1 }
 0x4ae   : > { %v2551_v61 = vpack.c.bf16 %v1802_v9, %v1796_v44 }
 0x4b0   : > { %v1915_v59 = vpop.f32.mrb[50].mxu1  ;;  %2552 = vmatprep.subr.bf16.mxu1 %v2551_v61 }
 0x4b1   : > { %v1917_v60 = vpop.f32.mrb[51].mxu1  ;;  %2554 = vmatpush1.bf16.msra.mxu1 %v2553_v49 }
 0x4b4   : > { %v1921_v21 = vpop.f32.mrb[52].mxu1 }
 0x4b5   : > { %v2557_v50 = vpack.c.bf16 %v1921_v21, %v1915_v59  ;;  %v1923_v41 = vpop.f32.mrb[53].mxu1 }
 0x4b6   : > { %v2555_v63 = vpack.c.bf16 %v1923_v41, %v1917_v60 }
 0x4b8   : > { %v1927_v51 = vpop.f32.mrb[54].mxu1  ;;  %2556 = vmatprep.subr.bf16.mxu1 %v2555_v63 }
 0x4b9   : > { %v1929_v56 = vpop.f32.mrb[55].mxu1  ;;  %2558 = vmatpush1.bf16.msra.mxu1 %v2557_v50 }
 0x4bc   : > { %v1933_v26 = vpop.f32.mrb[56].mxu1 }
 0x4bd   : > { %v2561_v7 = vpack.c.bf16 %v1933_v26, %v1927_v51  ;;  %v1935_v40 = vpop.f32.mrb[57].mxu1 }
 0x4be   : > { %v2559_v58 = vpack.c.bf16 %v1935_v40, %v1929_v56 }
 0x4c0   : > { %v2048_v29 = vpop.f32.mrb[58].mxu1  ;;  %2560 = vmatprep.subr.bf16.mxu1 %v2559_v58 }
 0x4c1   : > { %v2050_v11 = vpop.f32.mrb[59].mxu1  ;;  %2562 = vmatpush1.bf16.msra.mxu1 %v2561_v7 }
 0x4c4   : > { %v2054_v55 = vpop.f32.mrb[60].mxu1 }
 0x4c5   : > { %v2565_v17 = vpack.c.bf16 %v2054_v55, %v2048_v29  ;;  %v2056_v39 = vpop.f32.mrb[61].mxu1 }
 0x4c6   : > { %v2563_v45 = vpack.c.bf16 %v2056_v39, %v2050_v11  ;;  %v2325_v11 = vpop.permute.xlu1 %2324 }
 0x4c8   : > { %v2060_v18 = vpop.f32.mrb[62].mxu1  ;;  %2564 = vmatprep.subr.bf16.mxu1 %v2563_v45 }
 0x4c9   : > { %v2062_v8 = vpop.f32.mrb[63].mxu1  ;;  %2566 = vmatpush1.bf16.msra.mxu1 %v2565_v17 }
 0x4cc   : > { %v2066_v24 = vpop.f32.mrb[64].mxu1 }
 0x4cd   : > { %v2569_v52 = vpack.c.bf16 %v2066_v24, %v2060_v18  ;;  %v2068_v20 = vpop.f32.mrb[65].mxu1 }
 0x4ce   : > { %v2567_v10 = vpack.c.bf16 %v2068_v20, %v2062_v8 }
 0x4d0   : > { %v2181_v38 = vpop.f32.mrb[66].mxu1  ;;  %2568 = vmatprep.subr.bf16.mxu1 %v2567_v10 }
 0x4d1   : > { %v2183_v1 = vpop.f32.mrb[67].mxu1  ;;  %2570 = vmatpush1.bf16.msra.mxu1 %v2569_v52 }
 0x4d4   : > { %v2187_v36 = vpop.f32.mrb[68].mxu1 }
 0x4d5   : > { %v2573_v35 = vpack.c.bf16 %v2187_v36, %v2181_v38  ;;  %v2189_v2 = vpop.f32.mrb[69].mxu1 }
 0x4d6   : > { %v2571_v57 = vpack.c.bf16 %v2189_v2, %v2183_v1 }
 0x4d8   : > { %v2193_v43 = vpop.f32.mrb[70].mxu1  ;;  %2572 = vmatprep.subr.bf16.mxu1 %v2571_v57 }
 0x4d9   : > { %v2195_v54 = vpop.f32.mrb[71].mxu1  ;;  %2574 = vmatpush1.bf16.msra.mxu1 %v2573_v35 }
 0x4dc   : > { %v2199_v33 = vpop.f32.mrb[72].mxu1 }
 0x4dd   : > { %v2577_v4 = vpack.c.bf16 %v2199_v33, %v2193_v43  ;;  %v2201_v6 = vpop.f32.mrb[73].mxu1 }
 0x4de   : > { %v2575_v13 = vpack.c.bf16 %v2201_v6, %v2195_v54 }
 0x4e0   : > { %2576 = vmatprep.subr.bf16.mxu1 %v2575_v13 }
 0x4e1   : > { %2578 = vmatpush1.bf16.msra.mxu1 %v2577_v4 }
 0x4e4   : > { %2276 = vmatmul.mubr.f32.vlgmr.msra.gmra.mrb[74].mxu1 %v2204_v53 }
 0x5b7   : > { %v2277_v30 = vpop.f32.mrb[74].mxu1 }
 0x5b8   : > { %v2278_v47 = vadd.f32 %v2277_v30, %v2209_v5  ;;  %v2279_v28 = vpop.f32.mrb[75].mxu1 }
 0x5b9   : > { %v2280_v0 = vadd.f32 %v2279_v28, %v2209_v5 }
 0x5ba   : > { %v2282_v34 = vrot.slane %v2278_v47, 4 }
 0x5bb   : > { %v2288_v42 = vrot.slane %v2280_v0, 4 }
 0x5bc   : > { %v2283_v19 = vadd.f32 %v2282_v34, %v2278_v47 }
 0x5bd   : > { %v2289_v14 = vadd.f32 %v2288_v42, %v2280_v0 }
 0x5be   : > { %v2284_v3 = vrot.slane %v2283_v19, 2 }
 0x5bf   : > { %v2290_v22 = vrot.slane %v2289_v14, 2 }
 0x5c0   : > { %v2285_v32 = vadd.f32 %v2284_v3, %v2283_v19 }
 0x5c1   : > { %v2291_v62 = vadd.f32 %v2290_v22, %v2289_v14 }
 0x5c2   : > { %v2286_v27 = vrot.slane %v2285_v32, 1 }
 0x5c3   : > { %v2292_v46 = vrot.slane %v2291_v62, 1 }
 0x5c4   : > { %v2287_v37 = vadd.f32 %v2286_v27, %v2285_v32 }
 0x5c5   : > { %v2293_v25 = vadd.f32 %v2292_v46, %v2291_v62 }
 0x5c6   : > { %v2295_v15 = vmul.f32 0.125, %v2287_v37 }
 0x5c7   : > { %v2296_v31 = vmul.f32 0.125, %v2293_v25 }
 0x5c8   : > { %v2297_v48 = vsub.f32 %v2278_v47, %v2295_v15 }
 0x5c9   : > { %v2298_v23 = vsub.f32 %v2280_v0, %v2296_v31 }
 0x5ca   : > { %v2299_v16 = vmul.f32 %v2297_v48, %v2297_v48 }
 0x5cb   : > { %v2300_v44 = vmul.f32 %v2298_v23, %v2298_v23 }
 0x5cc   : > { %v2301_v12 = vrot.slane %v2299_v16, 4 }
 0x5cd   : > { %v2307_v49 = vrot.slane %v2300_v44, 4 }
 0x5ce   : > { %v2302_v9 = vadd.f32 %v2301_v12, %v2299_v16 }
 0x5cf   : > { %v2308_v61 = vadd.f32 %v2307_v49, %v2300_v44 }
 0x5d0   : > { %v2303_v59 = vrot.slane %v2302_v9, 2 }
 0x5d1   : > { %v2309_v60 = vrot.slane %v2308_v61, 2 }
 0x5d2   : > { %v2304_v21 = vadd.f32 %v2303_v59, %v2302_v9 }
 0x5d3   : > { %v2310_v50 = vadd.f32 %v2309_v60, %v2308_v61 }
 0x5d4   : > { %v2305_v41 = vrot.slane %v2304_v21, 1 }
 0x5d5   : > { %v2311_v63 = vrot.slane %v2310_v50, 1 }
 0x5d6   : > { %v2306_v51 = vadd.f32 %v2305_v41, %v2304_v21 }
 0x5d7   : > { %v2312_v56 = vadd.f32 %v2311_v63, %v2310_v50 }
 0x5d8   : > { %v2313_v26 = vmul.f32 0.125, %v2306_v51 }
 0x5d9   : > { %v2314_v7 = vmul.f32 0.125, %v2312_v56 }
 0x5da   : > { %v2315_v40 = vadd.f32 1e-05, %v2313_v26 }
 0x5db   : > { %v2316_v58 = vadd.f32 1e-05, %v2314_v7 }
 0x5dc   : > { %2800 = vrsqrt.f32 %v2315_v40 }
 0x5dd   : > { %2802 = vrsqrt.f32 %v2316_v58 }
 0x5e6   : > { %v2801_v29 = vpop.eup %2800 }
 0x5e7   : > { %v2803_v55 = vpop.eup %2802  ;;  %v2319_v17 = vmul.f32 %v2801_v29, %v2297_v48 }
 0x5e8   : > { %v2320_v39 = vmul.f32 %v2803_v55, %v2298_v23 }
 0x5e9   : > { %v2327_v45 = vmul.f32 %v2325_v11, %v2319_v17 }
 0x5ea   : > { %v2328_v18 = vmul.f32 %v2325_v11, %v2320_v39 }
 0x5eb   : > { %2329 = vst [vmem:[%s217_s25] sm:$0xff] %v2327_v45 }
 0x5ec   : > { %2330 = vst [vmem:[%s217_s25 + $0x8] sm:$0xff] %v2328_v18 }
 0x5ed   : > { %2817 = shalt.err (!%p2814_p3)
}
 0x5ee   : > { %s2818_s12 = scalar_lea.hbm %s3992_s7, 256  ;;  %s2822_s15 = scalar_lea.hbm %s4039_s5, 512 }
 0x5ef   : > { %p2819_p4 = scmp.ne.s32.totalorder %s3992_s7, %s2818_s12  ;;  %p2823_p9 = scmp.lt.u32.totalorder %s3992_s7, %s4039_s5 }
 0x5f0   : > { %p2824_p10 = scmp.lt.u32.totalorder %s2822_s15, %s2818_s12  ;;  %p2826_p12 = scmp.lt.u32.totalorder %s2818_s12, %s3992_s7 }
 0x5f1   : > { %p2820_p7 = pnand %p2819_p4, %p2939_p5 }
 0x5f2   : > { %p2825_p11 = por %p2824_p10, %p2823_p9 }
 0x5f3   : > { %p2821_p8 = pneg %p2820_p7 }
 0x5f4   : > { %p2827_p13 = por %p2826_p12, %p2825_p11 }
 0x5f6   : > { %p2828_p0 = pnand %p2827_p13, %p2821_p8 }
 0x5f8   : > { %2831 = shalt.err (!%p2828_p0)
}
 0x5f9   : > { %2581 = dma.vmem_to_hbm [thread:$0]  (%p2939_p5), %s3994_s26, 256, %s3992_s7, %s2332_s8  }
 0x5fa PF: > { %p2587_p1 = scmp.ge.s32.totalorder %s2866_s21, 2  ;;  %s2358_s23 = sand.u32 1, %s2854_s18  }
 0x5fb   : > { %s2359_s25 = scalar_lea.sflag [#allocation3], %s2358_s23 }
 0x5fc   : > { %p2584_p2 = pnand %p2587_p1, %p2943_p6 }
 0x5fe   : > { %2849 = dma.done.wait (!%p2584_p2), %s2359_s25, 256  }
 0x5ff   : > { %2851 = vsyncadd (!%p2584_p2), %s2359_s25, 4294967040  ;;  %p15_p3 = scmp.ge.s32.totalorder %s2926_s24, 4   ;;  %s4168_s18 = smov %s2858_s19 }
 0x600   : > { %s4169_s19 = smov %s2862_s20  ;;  %s4170_s20 = smov %s2937_s27 }
 0x601   : > { %s4171_s21 = smov %s2926_s24  ;;  %17 = sbr.rel (!%p15_p3) target bundleno = 3 (0x3), region = 75 }
 0x608   :  { %2364 = vsyncpa [#allocation3], 1 }
 0x609   :  { %2366 = vsyncpa [#allocation3 + $0x1], 1 }

</bundles_post_ra>
